<compile_context>
chip_gen: v6e
topology: v6e:2x2x1
jax: 0.10.0
libtpu: 0.0.40
codegen_flags: <defaults>
</compile_context>

<pallas_src>
import functools

import jax
import jax.numpy as jnp
from jax import lax
from jax.experimental import pallas as pl
from jax.experimental.pallas import tpu as pltpu


def _vmem_limit_bytes():
    # v5e/v6e have 128 MiB physical VMEM, v7x only 64 MiB -> derive the scoped
    # limit from the chip instead of hard-coding the v7x-safe minimum.
    try:
        cap = int(pltpu.get_tpu_info().vmem_capacity_bytes)
    except Exception:
        cap = 64 * 1024 * 1024
    return max(32 * 1024 * 1024, min(100 * 1024 * 1024, (cap * 3) // 4))


# ----------------------------------------------------------------------------
# Kernel 1: 3x3 conv (stride 1, pad 1) for one image, fused with per-image
#           per-channel sum / sum-of-squares partials for train-mode BN.
#           Output y is written NCHW-flat and lane-dense: (Cout, H*W).
# ----------------------------------------------------------------------------
def conv_stats_kernel(x_ref, w_ref, y_ref, sum_ref, ssq_ref, pad_s, patch_s,
                      *, H, W, Cin, KH, KW):
    HW = H * W
    cdt = pad_s.dtype

    # Re-zero only the 1-pixel halo each step (tiny; robust under megacore
    # scheduling since every grid step is independent and scratch is per-core).
    pad_s[0:1, :, :] = jnp.zeros((1, W + 2, Cin), cdt)
    pad_s[H + 1:H + 2, :, :] = jnp.zeros((1, W + 2, Cin), cdt)
    pad_s[:, 0:1, :] = jnp.zeros((H + 2, 1, Cin), cdt)
    pad_s[:, W + 1:W + 2, :] = jnp.zeros((H + 2, 1, Cin), cdt)

    # Interior of the padded tile: the pad never exists in HBM.
    pad_s[1:H + 1, 1:W + 1, :] = x_ref[...].astype(cdt)

    # im2col into VMEM (one pass over the input tile); column block
    # [tap*Cin, (tap+1)*Cin) holds the (ki, kj)-shifted window.
    for ki in range(KH):
        for kj in range(KW):
            tap = ki * KW + kj
            patch_s[:, tap * Cin:(tap + 1) * Cin] = (
                pad_s[ki:ki + H, kj:kj + W, :].reshape(HW, Cin))

    # Single MXU dot, K = KH*KW*Cin, f32 accumulation, emitted directly as
    # (Cout, H*W) so the store (and everything downstream) is lane-dense and
    # already NCHW-ordered.
    acc = lax.dot_general(
        w_ref[...], patch_s[...],                    # (Cout, 9Cin) x (HW, 9Cin)^T
        dimension_numbers=(((1,), (1,)), ((), ())),
        preferred_element_type=jnp.float32)          # -> (Cout, HW) f32

    y_ref[...] = acc.astype(y_ref.dtype)

    # Per-image batch-stat partials (reduced over N in the wrapper; tiny HBM).
    sum_ref[...] = jnp.sum(acc, axis=1, keepdims=True)
    ssq_ref[...] = jnp.sum(acc * acc, axis=1, keepdims=True)


# ----------------------------------------------------------------------------
# Kernel 2: elementwise BatchNorm (folded scale/shift) + ReLU on the NCHW-flat
#           (N*Cout, H*W) view -> lane-dense loads/stores, no final transpose.
# ----------------------------------------------------------------------------
def bn_relu_kernel(y_ref, scale_ref, shift_ref, o_ref):
    y = y_ref[...].astype(jnp.float32)
    o_ref[...] = jnp.maximum(y * scale_ref[...] + shift_ref[...], 0.0)


def conv2d_block(x_nchw, w, b, gamma, beta, *, eps=1e-5,
                 compute_dtype=jnp.bfloat16):
    """Forward of Conv2dBlock: Conv2d(3x3,s1,p1) -> BatchNorm2d(train) -> ReLU.

    x_nchw: (N, Cin, H, W) f32;  w: (Cout, Cin, 3, 3);  b: (Cout,) conv bias
    (unused: it cancels exactly under training-mode BN);  gamma/beta: (Cout,).
    Streams in `compute_dtype` (bf16 default) with f32 MXU accumulation.
    """
    del b  # conv bias cancels under train-mode BN (valid only for batch stats)
    N, Cin, H, W = x_nchw.shape
    Cout, _, KH, KW = w.shape
    assert (KH, KW) == (3, 3), "this kernel implements the module default 3x3"
    assert Cout % 8 == 0, "Cout must be a multiple of 8 (sublane tiling of y)"
    HW = H * W
    M = N * HW
    vmem_limit = _vmem_limit_bytes()

    # glue (XLA): NCHW -> NHWC fused with the bf16 cast; no spatial pad in HBM.
    x_nhwc = jnp.transpose(x_nchw, (0, 2, 3, 1)).astype(compute_dtype)
    # (Cout, Cin, KH, KW) -> (Cout, KH*KW*Cin), tap-major columns (match patch).
    w_c = jnp.transpose(w, (0, 2, 3, 1)).reshape(Cout, KH * KW * Cin)
    w_c = w_c.astype(compute_dtype)

    kern1 = functools.partial(conv_stats_kernel, H=H, W=W, Cin=Cin, KH=KH, KW=KW)

    # ---- Pallas kernel 1: conv + batch-stat partials (grid over images) ----
    y_flat, psum, pssq = pl.pallas_call(
        kern1,
        out_shape=(
            jax.ShapeDtypeStruct((N * Cout, HW), compute_dtype),  # y, NCHW-flat
            jax.ShapeDtypeStruct((N, Cout, 1), jnp.float32),      # per-image sums
            jax.ShapeDtypeStruct((N, Cout, 1), jnp.float32),      # per-image ssq
        ),
        grid_spec=pltpu.PrefetchScalarGridSpec(
            num_scalar_prefetch=0,
            grid=(N,),
            in_specs=[
                pl.BlockSpec((None, H, W, Cin), lambda n: (n, 0, 0, 0)),
                pl.BlockSpec((Cout, KH * KW * Cin), lambda n: (0, 0)),
            ],
            out_specs=(
                pl.BlockSpec((Cout, HW), lambda n: (n, 0)),
                pl.BlockSpec((None, Cout, 1), lambda n: (n, 0, 0)),
                pl.BlockSpec((None, Cout, 1), lambda n: (n, 0, 0)),
            ),
            scratch_shapes=[
                pltpu.VMEM((H + 2, W + 2, Cin), compute_dtype),   # padded tile
                pltpu.VMEM((HW, KH * KW * Cin), compute_dtype),   # im2col patch
            ],
        ),
        compiler_params=pltpu.CompilerParams(
            dimension_semantics=("parallel",),
            vmem_limit_bytes=vmem_limit,
        ),
    )(x_nhwc, w_c)

    # ---- glue (XLA): fold BN batch statistics (biased variance, train mode) --
    total = jnp.sum(psum, axis=0).reshape(Cout)
    total_sq = jnp.sum(pssq, axis=0).reshape(Cout)
    mean = total / jnp.float32(M)
    var = jnp.maximum(total_sq / jnp.float32(M) - mean * mean, 0.0)
    scale = gamma.astype(jnp.float32) * lax.rsqrt(var + jnp.float32(eps))
    shift = beta.astype(jnp.float32) - mean * scale

    # kernel-2 tile: rows of the (N*Cout, HW) view, sized from the VMEM budget
    # (decoupled from H*W); row count kept a multiple of Cout so a single
    # W-agnostic (tr, 1) scale/shift tile works for every block.
    rows = N * Cout
    row_bytes = HW * (4 + jnp.dtype(compute_dtype).itemsize)
    cands = [t for t in range(Cout, rows + 1, Cout)
             if rows % t == 0 and (t % 8 == 0 or t == rows)
             and t * row_bytes <= vmem_limit // 4]
    tr = max(cands) if cands else rows
    scale_t = jnp.tile(scale.reshape(Cout, 1), (tr // Cout, 1))   # (tr, 1)
    shift_t = jnp.tile(shift.reshape(Cout, 1), (tr // Cout, 1))   # (tr, 1)

    # ---- Pallas kernel 2: normalize + ReLU (lane-dense, NCHW-flat) ----
    out_flat = pl.pallas_call(
        bn_relu_kernel,
        out_shape=jax.ShapeDtypeStruct((rows, HW), jnp.float32),
        grid_spec=pltpu.PrefetchScalarGridSpec(
            num_scalar_prefetch=0,
            grid=(rows // tr,),
            in_specs=[
                pl.BlockSpec((tr, HW), lambda i: (i, 0)),
                pl.BlockSpec((tr, 1), lambda i: (0, 0)),
                pl.BlockSpec((tr, 1), lambda i: (0, 0)),
            ],
            out_specs=pl.BlockSpec((tr, HW), lambda i: (i, 0)),
        ),
        compiler_params=pltpu.CompilerParams(
            dimension_semantics=("parallel",),
            vmem_limit_bytes=vmem_limit,
        ),
    )(y_flat, scale_t, shift_t)

    # (N*Cout, H*W) is already NCHW-contiguous: free metadata reshape only.
    return out_flat.reshape(N, Cout, H, W)


def reference(x_nchw, w, b, gamma, beta, eps=1e-5):
    # pure-JAX reference: conv2d (NCHW, with bias) + training-mode BN + ReLU
    y = lax.conv_general_dilated(
        x_nchw, w, window_strides=(1, 1), padding=((1, 1), (1, 1)),
        dimension_numbers=("NCHW", "OIHW", "NCHW"))
    y = y + b.reshape(1, -1, 1, 1)
    mean = jnp.mean(y, axis=(0, 2, 3), keepdims=True)
    var = jnp.mean((y - mean) ** 2, axis=(0, 2, 3), keepdims=True)
    y = (y - mean) / jnp.sqrt(var + eps)
    y = y * gamma.reshape(1, -1, 1, 1) + beta.reshape(1, -1, 1, 1)
    return jnp.maximum(y, 0.0)


if __name__ == "__main__":
    key = jax.random.PRNGKey(0)
    k_x, k_w, k_b, k_g, k_be = jax.random.split(key, 5)

    N, Cin, H, W = 2, 4, 16, 16
    Cout = 8

    x = jax.random.normal(k_x, (N, Cin, H, W), dtype=jnp.float32)
    fan_in = Cin * 3 * 3
    w = jax.random.normal(k_w, (Cout, Cin, 3, 3), dtype=jnp.float32) / jnp.sqrt(fan_in)
    b = 0.1 * jax.random.normal(k_b, (Cout,), dtype=jnp.float32)
    gamma = 1.0 + 0.1 * jax.random.normal(k_g, (Cout,), dtype=jnp.float32)
    beta = 0.1 * jax.random.normal(k_be, (Cout,), dtype=jnp.float32)

    ref = reference(x, w, b, gamma, beta)

    # Exact-math check: f32 streams must match the f32 reference tightly.
    f_f32 = jax.jit(functools.partial(conv2d_block, compute_dtype=jnp.float32))
    out_f32 = jax.block_until_ready(f_f32(x, w, b, gamma, beta))
    assert out_f32.shape == (N, Cout, H, W)
    assert jnp.allclose(out_f32, ref, atol=1e-4, rtol=1e-4), \
        f"f32 max err {jnp.max(jnp.abs(out_f32 - ref))}"

    # Perf configuration: bf16 streamed operands + bf16 y intermediate with f32
    # accumulation -> looser tolerance (bf16 carries ~3 decimal digits).
    f_bf16 = jax.jit(functools.partial(conv2d_block, compute_dtype=jnp.bfloat16))
    out = jax.block_until_ready(f_bf16(x, w, b, gamma, beta))
    assert out.shape == (N, Cout, H, W)
    assert jnp.allclose(out, ref, atol=5e-2, rtol=5e-2), \
        f"bf16 max err {jnp.max(jnp.abs(out - ref))}"

    print("KERNEL_OK")
</pallas_src>

<mosaic_0001>
module attributes {stable_mosaic.version = 11 : i64} {
  func.func @conv_stats_kernel(%arg0: i32, %arg1: memref<1x16x16x4xf32, #tpu.memory_space<vmem>>, %arg2: memref<8x36xf32, #tpu.memory_space<vmem>>, %arg3: memref<8x256xf32, #tpu.memory_space<vmem>>, %arg4: memref<1x8x1xf32, #tpu.memory_space<vmem>>, %arg5: memref<1x8x1xf32, #tpu.memory_space<vmem>>, %arg6: memref<18x18x4xf32, #tpu.memory_space<vmem>>, %arg7: memref<256x36xf32, #tpu.memory_space<vmem>>) attributes {dimension_semantics = [#tpu.dimension_semantics<parallel>], iteration_bounds = array<i64: 2>, scalar_prefetch = 0 : i64, scratch_operands = 2 : i64, tpu.core_type = #tpu.core_type<tc>, window_params = [{transform_indices = @transform_0, window_bounds = array<i64: 1, 16, 16, 4>}, {pipeline_mode = #tpu.pipeline_mode<synchronous>, transform_indices = @transform_1, window_bounds = array<i64: 8, 36>}, {transform_indices = @transform_2, window_bounds = array<i64: 8, 256>}, {transform_indices = @transform_3, window_bounds = array<i64: 1, 8, 1>}, {transform_indices = @transform_4, window_bounds = array<i64: 1, 8, 1>}]} {
    %cst = arith.constant 0.000000e+00 : f32
    %0 = vector.broadcast %cst : f32 to vector<1x18x4xf32>
    %c0 = arith.constant 0 : index
    %c0_0 = arith.constant 0 : index
    %c0_1 = arith.constant 0 : index
    %1 = vector.load %arg6[%c0, %c0_0, %c0_1] : memref<18x18x4xf32, #tpu.memory_space<vmem>>, vector<1x18x4xf32>
    tpu.vector_store %arg6[%c0, %c0_0, %c0_1], %0 {strides = array<i32>} : memref<18x18x4xf32, #tpu.memory_space<vmem>>, vector<1x18x4xf32>,
    %cst_2 = arith.constant 0.000000e+00 : f32
    %2 = vector.broadcast %cst_2 : f32 to vector<1x18x4xf32>
    %c17 = arith.constant 17 : index
    %c0_3 = arith.constant 0 : index
    %c0_4 = arith.constant 0 : index
    %3 = vector.load %arg6[%c17, %c0_3, %c0_4] : memref<18x18x4xf32, #tpu.memory_space<vmem>>, vector<1x18x4xf32>
    tpu.vector_store %arg6[%c17, %c0_3, %c0_4], %2 {strides = array<i32>} : memref<18x18x4xf32, #tpu.memory_space<vmem>>, vector<1x18x4xf32>,
    %cst_5 = arith.constant 0.000000e+00 : f32
    %4 = vector.broadcast %cst_5 : f32 to vector<18x1x4xf32>
    %c0_6 = arith.constant 0 : index
    %c0_7 = arith.constant 0 : index
    %c0_8 = arith.constant 0 : index
    %5 = vector.load %arg6[%c0_6, %c0_7, %c0_8] : memref<18x18x4xf32, #tpu.memory_space<vmem>>, vector<18x1x4xf32>
    tpu.vector_store %arg6[%c0_6, %c0_7, %c0_8], %4 {strides = array<i32>} : memref<18x18x4xf32, #tpu.memory_space<vmem>>, vector<18x1x4xf32>,
    %cst_9 = arith.constant 0.000000e+00 : f32
    %6 = vector.broadcast %cst_9 : f32 to vector<18x1x4xf32>
    %c0_10 = arith.constant 0 : index
    %c17_11 = arith.constant 17 : index
    %c0_12 = arith.constant 0 : index
    %7 = vector.load %arg6[%c0_10, %c17_11, %c0_12] : memref<18x18x4xf32, #tpu.memory_space<vmem>>, vector<18x1x4xf32>
    tpu.vector_store %arg6[%c0_10, %c17_11, %c0_12], %6 {strides = array<i32>} : memref<18x18x4xf32, #tpu.memory_space<vmem>>, vector<18x1x4xf32>,
    %c0_13 = arith.constant 0 : index
    %c0_14 = arith.constant 0 : index
    %c0_15 = arith.constant 0 : index
    %c0_16 = arith.constant 0 : index
    %8 = vector.load %arg1[%c0_13, %c0_14, %c0_15, %c0_16] : memref<1x16x16x4xf32, #tpu.memory_space<vmem>>, vector<1x16x16x4xf32>
    %9 = vector.shape_cast %8 : vector<1x16x16x4xf32> to vector<16x16x4xf32>
    %c1 = arith.constant 1 : index
    %c1_17 = arith.constant 1 : index
    %c0_18 = arith.constant 0 : index
    %10 = vector.load %arg6[%c1, %c1_17, %c0_18] : memref<18x18x4xf32, #tpu.memory_space<vmem>>, vector<16x16x4xf32>
    tpu.vector_store %arg6[%c1, %c1_17, %c0_18], %9 {strides = array<i32>} : memref<18x18x4xf32, #tpu.memory_space<vmem>>, vector<16x16x4xf32>,
    %c0_19 = arith.constant 0 : index
    %c0_20 = arith.constant 0 : index
    %c0_21 = arith.constant 0 : index
    %11 = vector.load %arg6[%c0_19, %c0_20, %c0_21] : memref<18x18x4xf32, #tpu.memory_space<vmem>>, vector<16x16x4xf32>
    %12 = vector.shape_cast %11 : vector<16x16x4xf32> to vector<256x4xf32>
    %c0_22 = arith.constant 0 : index
    %c0_23 = arith.constant 0 : index
    %13 = vector.load %arg7[%c0_22, %c0_23] : memref<256x36xf32, #tpu.memory_space<vmem>>, vector<256x4xf32>
    tpu.vector_store %arg7[%c0_22, %c0_23], %12 {strides = array<i32>} : memref<256x36xf32, #tpu.memory_space<vmem>>, vector<256x4xf32>,
    %c0_24 = arith.constant 0 : index
    %c1_25 = arith.constant 1 : index
    %c0_26 = arith.constant 0 : index
    %14 = vector.load %arg6[%c0_24, %c1_25, %c0_26] : memref<18x18x4xf32, #tpu.memory_space<vmem>>, vector<16x16x4xf32>
    %15 = vector.shape_cast %14 : vector<16x16x4xf32> to vector<256x4xf32>
    %c0_27 = arith.constant 0 : index
    %c4 = arith.constant 4 : index
    %16 = vector.load %arg7[%c0_27, %c4] : memref<256x36xf32, #tpu.memory_space<vmem>>, vector<256x4xf32>
    tpu.vector_store %arg7[%c0_27, %c4], %15 {strides = array<i32>} : memref<256x36xf32, #tpu.memory_space<vmem>>, vector<256x4xf32>,
    %c0_28 = arith.constant 0 : index
    %c2 = arith.constant 2 : index
    %c0_29 = arith.constant 0 : index
    %17 = vector.load %arg6[%c0_28, %c2, %c0_29] : memref<18x18x4xf32, #tpu.memory_space<vmem>>, vector<16x16x4xf32>
    %18 = vector.shape_cast %17 : vector<16x16x4xf32> to vector<256x4xf32>
    %c0_30 = arith.constant 0 : index
    %c8 = arith.constant 8 : index
    %19 = vector.load %arg7[%c0_30, %c8] : memref<256x36xf32, #tpu.memory_space<vmem>>, vector<256x4xf32>
    tpu.vector_store %arg7[%c0_30, %c8], %18 {strides = array<i32>} : memref<256x36xf32, #tpu.memory_space<vmem>>, vector<256x4xf32>,
    %c1_31 = arith.constant 1 : index
    %c0_32 = arith.constant 0 : index
    %c0_33 = arith.constant 0 : index
    %20 = vector.load %arg6[%c1_31, %c0_32, %c0_33] : memref<18x18x4xf32, #tpu.memory_space<vmem>>, vector<16x16x4xf32>
    %21 = vector.shape_cast %20 : vector<16x16x4xf32> to vector<256x4xf32>
    %c0_34 = arith.constant 0 : index
    %c12 = arith.constant 12 : index
    %22 = vector.load %arg7[%c0_34, %c12] : memref<256x36xf32, #tpu.memory_space<vmem>>, vector<256x4xf32>
    tpu.vector_store %arg7[%c0_34, %c12], %21 {strides = array<i32>} : memref<256x36xf32, #tpu.memory_space<vmem>>, vector<256x4xf32>,
    %c1_35 = arith.constant 1 : index
    %c1_36 = arith.constant 1 : index
    %c0_37 = arith.constant 0 : index
    %23 = vector.load %arg6[%c1_35, %c1_36, %c0_37] : memref<18x18x4xf32, #tpu.memory_space<vmem>>, vector<16x16x4xf32>
    %24 = vector.shape_cast %23 : vector<16x16x4xf32> to vector<256x4xf32>
    %c0_38 = arith.constant 0 : index
    %c16 = arith.constant 16 : index
    %25 = vector.load %arg7[%c0_38, %c16] : memref<256x36xf32, #tpu.memory_space<vmem>>, vector<256x4xf32>
    tpu.vector_store %arg7[%c0_38, %c16], %24 {strides = array<i32>} : memref<256x36xf32, #tpu.memory_space<vmem>>, vector<256x4xf32>,
    %c1_39 = arith.constant 1 : index
    %c2_40 = arith.constant 2 : index
    %c0_41 = arith.constant 0 : index
    %26 = vector.load %arg6[%c1_39, %c2_40, %c0_41] : memref<18x18x4xf32, #tpu.memory_space<vmem>>, vector<16x16x4xf32>
    %27 = vector.shape_cast %26 : vector<16x16x4xf32> to vector<256x4xf32>
    %c0_42 = arith.constant 0 : index
    %c20 = arith.constant 20 : index
    %28 = vector.load %arg7[%c0_42, %c20] : memref<256x36xf32, #tpu.memory_space<vmem>>, vector<256x4xf32>
    tpu.vector_store %arg7[%c0_42, %c20], %27 {strides = array<i32>} : memref<256x36xf32, #tpu.memory_space<vmem>>, vector<256x4xf32>,
    %c2_43 = arith.constant 2 : index
    %c0_44 = arith.constant 0 : index
    %c0_45 = arith.constant 0 : index
    %29 = vector.load %arg6[%c2_43, %c0_44, %c0_45] : memref<18x18x4xf32, #tpu.memory_space<vmem>>, vector<16x16x4xf32>
    %30 = vector.shape_cast %29 : vector<16x16x4xf32> to vector<256x4xf32>
    %c0_46 = arith.constant 0 : index
    %c24 = arith.constant 24 : index
    %31 = vector.load %arg7[%c0_46, %c24] : memref<256x36xf32, #tpu.memory_space<vmem>>, vector<256x4xf32>
    tpu.vector_store %arg7[%c0_46, %c24], %30 {strides = array<i32>} : memref<256x36xf32, #tpu.memory_space<vmem>>, vector<256x4xf32>,
    %c2_47 = arith.constant 2 : index
    %c1_48 = arith.constant 1 : index
    %c0_49 = arith.constant 0 : index
    %32 = vector.load %arg6[%c2_47, %c1_48, %c0_49] : memref<18x18x4xf32, #tpu.memory_space<vmem>>, vector<16x16x4xf32>
    %33 = vector.shape_cast %32 : vector<16x16x4xf32> to vector<256x4xf32>
    %c0_50 = arith.constant 0 : index
    %c28 = arith.constant 28 : index
    %34 = vector.load %arg7[%c0_50, %c28] : memref<256x36xf32, #tpu.memory_space<vmem>>, vector<256x4xf32>
    tpu.vector_store %arg7[%c0_50, %c28], %33 {strides = array<i32>} : memref<256x36xf32, #tpu.memory_space<vmem>>, vector<256x4xf32>,
    %c2_51 = arith.constant 2 : index
    %c2_52 = arith.constant 2 : index
    %c0_53 = arith.constant 0 : index
    %35 = vector.load %arg6[%c2_51, %c2_52, %c0_53] : memref<18x18x4xf32, #tpu.memory_space<vmem>>, vector<16x16x4xf32>
    %36 = vector.shape_cast %35 : vector<16x16x4xf32> to vector<256x4xf32>
    %c0_54 = arith.constant 0 : index
    %c32 = arith.constant 32 : index
    %37 = vector.load %arg7[%c0_54, %c32] : memref<256x36xf32, #tpu.memory_space<vmem>>, vector<256x4xf32>
    tpu.vector_store %arg7[%c0_54, %c32], %36 {strides = array<i32>} : memref<256x36xf32, #tpu.memory_space<vmem>>, vector<256x4xf32>,
    %c0_55 = arith.constant 0 : index
    %c0_56 = arith.constant 0 : index
    %38 = vector.load %arg2[%c0_55, %c0_56] : memref<8x36xf32, #tpu.memory_space<vmem>>, vector<8x36xf32>
    %c0_57 = arith.constant 0 : index
    %c0_58 = arith.constant 0 : index
    %39 = vector.load %arg7[%c0_57, %c0_58] : memref<256x36xf32, #tpu.memory_space<vmem>>, vector<256x36xf32>
    %cst_59 = arith.constant dense<0.000000e+00> : vector<8x256xf32>
    %40 = tpu.matmul %38, %39, %cst_59 {dimension_numbers = #tpu.dot_dimension_numbers<[1], [1], [0], [0], [0, 0, 1, 0], [], []>} : vector<8x36xf32>, vector<256x36xf32>, vector<8x256xf32> -> vector<8x256xf32>
    %c0_60 = arith.constant 0 : index
    %c0_61 = arith.constant 0 : index
    %41 = vector.load %arg3[%c0_60, %c0_61] : memref<8x256xf32, #tpu.memory_space<vmem>>, vector<8x256xf32>
    tpu.vector_store %arg3[%c0_60, %c0_61], %40 {strides = array<i32>} : memref<8x256xf32, #tpu.memory_space<vmem>>, vector<8x256xf32>,
    %cst_62 = arith.constant dense<0.000000e+00> : vector<8xf32>
    %42 = vector.multi_reduction <add>, %40, %cst_62 [1] : vector<8x256xf32> to vector<8xf32>
    %43 = vector.shape_cast %42 : vector<8xf32> to vector<8x1xf32>
    %c0_63 = arith.constant 0 : index
    %c0_64 = arith.constant 0 : index
    %c0_65 = arith.constant 0 : index
    %44 = vector.load %arg4[%c0_63, %c0_64, %c0_65] : memref<1x8x1xf32, #tpu.memory_space<vmem>>, vector<1x8x1xf32>
    %45 = vector.shape_cast %44 : vector<1x8x1xf32> to vector<8x1xf32>
    %46 = vector.shape_cast %43 : vector<8x1xf32> to vector<1x8x1xf32>
    tpu.vector_store %arg4[%c0_63, %c0_64, %c0_65], %46 {strides = array<i32>} : memref<1x8x1xf32, #tpu.memory_space<vmem>>, vector<1x8x1xf32>,
    %47 = arith.mulf %40, %40 : vector<8x256xf32>
    %cst_66 = arith.constant dense<0.000000e+00> : vector<8xf32>
    %48 = vector.multi_reduction <add>, %47, %cst_66 [1] : vector<8x256xf32> to vector<8xf32>
    %49 = vector.shape_cast %48 : vector<8xf32> to vector<8x1xf32>
    %c0_67 = arith.constant 0 : index
    %c0_68 = arith.constant 0 : index
    %c0_69 = arith.constant 0 : index
    %50 = vector.load %arg5[%c0_67, %c0_68, %c0_69] : memref<1x8x1xf32, #tpu.memory_space<vmem>>, vector<1x8x1xf32>
    %51 = vector.shape_cast %50 : vector<1x8x1xf32> to vector<8x1xf32>
    %52 = vector.shape_cast %49 : vector<8x1xf32> to vector<1x8x1xf32>
    tpu.vector_store %arg5[%c0_67, %c0_68, %c0_69], %52 {strides = array<i32>} : memref<1x8x1xf32, #tpu.memory_space<vmem>>, vector<1x8x1xf32>,
    return
  }
  func.func @transform_0(%arg0: i32) -> (i32, i32, i32, i32) {
    %c0_i32 = arith.constant 0 : i32
    %c0_i32_0 = arith.constant 0 : i32
    %c0_i32_1 = arith.constant 0 : i32
    %c0_i32_2 = arith.constant 0 : i32
    return %arg0, %c0_i32, %c0_i32_0, %c0_i32_1 : i32, i32, i32, i32
  }
  func.func @transform_1(%arg0: i32) -> (i32, i32) {
    %c0_i32 = arith.constant 0 : i32
    %c0_i32_0 = arith.constant 0 : i32
    %c0_i32_1 = arith.constant 0 : i32
    return %c0_i32, %c0_i32_0 : i32, i32
  }
  func.func @transform_2(%arg0: i32) -> (i32, i32) {
    %c0_i32 = arith.constant 0 : i32
    %c0_i32_0 = arith.constant 0 : i32
    return %arg0, %c0_i32 : i32, i32
  }
  func.func @transform_3(%arg0: i32) -> (i32, i32, i32) {
    %c0_i32 = arith.constant 0 : i32
    %c0_i32_0 = arith.constant 0 : i32
    %c0_i32_1 = arith.constant 0 : i32
    return %arg0, %c0_i32, %c0_i32_0 : i32, i32, i32
  }
  func.func @transform_4(%arg0: i32) -> (i32, i32, i32) {
    %c0_i32 = arith.constant 0 : i32
    %c0_i32_0 = arith.constant 0 : i32
    %c0_i32_1 = arith.constant 0 : i32
    return %arg0, %c0_i32, %c0_i32_0 : i32, i32, i32
  }
}

module attributes {stable_mosaic.version = 11 : i64} {
  func.func @bn_relu_kernel(%arg0: i32, %arg1: memref<16x256xf32, #tpu.memory_space<vmem>>, %arg2: memref<16x1xf32, #tpu.memory_space<vmem>>, %arg3: memref<16x1xf32, #tpu.memory_space<vmem>>, %arg4: memref<16x256xf32, #tpu.memory_space<vmem>>) attributes {dimension_semantics = [#tpu.dimension_semantics<parallel>], iteration_bounds = array<i64: 1>, scalar_prefetch = 0 : i64, scratch_operands = 0 : i64, tpu.core_type = #tpu.core_type<tc>, window_params = [{transform_indices = @transform_0, window_bounds = array<i64: 16, 256>}, {pipeline_mode = #tpu.pipeline_mode<synchronous>, transform_indices = @transform_1, window_bounds = array<i64: 16, 1>}, {pipeline_mode = #tpu.pipeline_mode<synchronous>, transform_indices = @transform_2, window_bounds = array<i64: 16, 1>}, {transform_indices = @transform_3, window_bounds = array<i64: 16, 256>}]} {
    %c0 = arith.constant 0 : index
    %c0_0 = arith.constant 0 : index
    %0 = vector.load %arg1[%c0, %c0_0] : memref<16x256xf32, #tpu.memory_space<vmem>>, vector<16x256xf32>
    %c0_1 = arith.constant 0 : index
    %c0_2 = arith.constant 0 : index
    %1 = vector.load %arg2[%c0_1, %c0_2] : memref<16x1xf32, #tpu.memory_space<vmem>>, vector<16x1xf32>
    %2 = vector.broadcast %1 : vector<16x1xf32> to vector<16x256xf32>
    %3 = arith.mulf %0, %2 : vector<16x256xf32>
    %c0_3 = arith.constant 0 : index
    %c0_4 = arith.constant 0 : index
    %4 = vector.load %arg3[%c0_3, %c0_4] : memref<16x1xf32, #tpu.memory_space<vmem>>, vector<16x1xf32>
    %5 = vector.broadcast %4 : vector<16x1xf32> to vector<16x256xf32>
    %6 = arith.addf %3, %5 : vector<16x256xf32>
    %cst = arith.constant 0.000000e+00 : f32
    %7 = vector.broadcast %cst : f32 to vector<16x256xf32>
    %8 = arith.maximumf %6, %7 : vector<16x256xf32>
    %c0_5 = arith.constant 0 : index
    %c0_6 = arith.constant 0 : index
    %9 = vector.load %arg4[%c0_5, %c0_6] : memref<16x256xf32, #tpu.memory_space<vmem>>, vector<16x256xf32>
    tpu.vector_store %arg4[%c0_5, %c0_6], %8 {strides = array<i32>} : memref<16x256xf32, #tpu.memory_space<vmem>>, vector<16x256xf32>,
    return
  }
  func.func @transform_0(%arg0: i32) -> (i32, i32) {
    %c0_i32 = arith.constant 0 : i32
    %c0_i32_0 = arith.constant 0 : i32
    return %arg0, %c0_i32 : i32, i32
  }
  func.func @transform_1(%arg0: i32) -> (i32, i32) {
    %c0_i32 = arith.constant 0 : i32
    %c0_i32_0 = arith.constant 0 : i32
    %c0_i32_1 = arith.constant 0 : i32
    return %c0_i32, %c0_i32_0 : i32, i32
  }
  func.func @transform_2(%arg0: i32) -> (i32, i32) {
    %c0_i32 = arith.constant 0 : i32
    %c0_i32_0 = arith.constant 0 : i32
    %c0_i32_1 = arith.constant 0 : i32
    return %c0_i32, %c0_i32_0 : i32, i32
  }
  func.func @transform_3(%arg0: i32) -> (i32, i32) {
    %c0_i32 = arith.constant 0 : i32
    %c0_i32_0 = arith.constant 0 : i32
    return %arg0, %c0_i32 : i32, i32
  }
}

</mosaic_0001>

<bundles_post_ra>
// kernel: conv2d_block.3
= control target key start
LH: loop header
LB: loop body
LE: loop exit
PB: predicated region body
PF: predicated region fallthrough
CT: control target
= control target key end

     0   :  { %v65_v0 = vmov 0   ;;  %s122_s2 = inlined_call_operand.vmem [shape: f32[16,1], index: 2, kind: input, shape index: {}]   ;;  %s123_s1 = inlined_call_operand.vmem [shape: f32[16,1], index: 1, kind: input, shape index: {}]   ;;  %s124_s0 = inlined_call_operand.vmem [shape: f32[16,256], index: 0, kind: input, shape index: {}]   ;;  %s125_s3 = inlined_call_operand.vmem [shape: f32[16,256], index: 3, kind: output, shape index: {}]  }
   0x1   :  { %64 = vset.pattern.permute.xlu1 %v65_v0  ;;  %63 = vset.pattern.permute.xlu0 %v65_v0  ;;  %v34_v1 = vld [vmem:[%s122_s2] sm:$0xff]  ;;  %v35_v3 = vld [vmem:[%s122_s2 + $0x8] sm:$0xff]  ;;  %v16_v11 = vld [vmem:[%s124_s0 + $0x10] sm:$0xff] }
   0x2   :  { %v18_v2 = vld [vmem:[%s123_s1] sm:$0xff]  ;;  %38 = vperm.xlu1 %64, %v34_v1   ;;  %v19_v4 = vld [vmem:[%s123_s1 + $0x8] sm:$0xff]  ;;  %v17_v12 = vld [vmem:[%s124_s0 + $0x18] sm:$0xff] }
   0x3   :  { %22 = vperm.xlu0 %63, %v18_v2   ;;  %v14_v5 = vld [vmem:[%s124_s0] sm:$0xff]  ;;  %v15_v6 = vld [vmem:[%s124_s0 + $0x8] sm:$0xff] }
   0x6   :  { %43 = vperm.xlu1 %64, %v35_v3  }
   0x7   :  { %27 = vperm.xlu0 %63, %v19_v4  }
  0x7d   :  { %v39_v7 = vpop.permute.xlu1 %38 }
  0x7e   :  { %v23_v8 = vpop.permute.xlu0 %22 }
  0x7f   :  { %v30_v9 = vmul.f32 %v23_v8, %v14_v5  ;;  %v31_v10 = vmul.f32 %v23_v8, %v15_v6 }
  0x81   :  { %v46_v13 = vadd.f32 %v39_v7, %v30_v9  ;;  %v47_v14 = vadd.f32 %v39_v7, %v31_v10  ;;  %v44_v20 = vpop.permute.xlu1 %43 }
  0x82   :  { %v28_v15 = vpop.permute.xlu0 %27 }
  0x83   :  { %v50_v16 = vmax.f32 %v46_v13, 0.0  ;;  %v51_v17 = vmax.f32 %v47_v14, 0.0  ;;  %v32_v18 = vmul.f32 %v28_v15, %v16_v11  ;;  %v33_v19 = vmul.f32 %v28_v15, %v17_v12 }
  0x85   :  { %54 = vst [vmem:[%s125_s3] sm:$0xff] %v50_v16  ;;  %55 = vst [vmem:[%s125_s3 + $0x8] sm:$0xff] %v51_v17  ;;  %v48_v21 = vadd.f32 %v44_v20, %v32_v18  ;;  %v49_v22 = vadd.f32 %v44_v20, %v33_v19 }
  0x87   :  { %v52_v23 = vmax.f32 %v48_v21, 0.0  ;;  %v53_v24 = vmax.f32 %v49_v22, 0.0 }
  0x89   :  { %56 = vst [vmem:[%s125_s3 + $0x10] sm:$0xff] %v52_v23  ;;  %57 = vst [vmem:[%s125_s3 + $0x18] sm:$0xff] %v53_v24 }

// kernel: conv2d_block.2
= control target key start
LH: loop header
LB: loop body
LE: loop exit
PB: predicated region body
PF: predicated region fallthrough
CT: control target
= control target key end

     0   :  { %s2414_s15 = smov 0   ;;  %s3534_s0 = inlined_call_operand.vmem [shape: f32[2,16,16,4], index: 0, kind: input, shape index: {}]   ;;  %s3535_s1 = inlined_call_operand.vmem [shape: f32[8,36], index: 1, kind: input, shape index: {}]   ;;  %s3536_s2 = inlined_call_operand.vmem [shape: f32[16,256], index: 2, kind: output, shape index: {0}]   ;;  %s3537_s3 = inlined_call_operand.vmem [shape: f32[2,8,1], index: 3, kind: output, shape index: {1}]   ;;  %s3538_s4 = inlined_call_operand.vmem [shape: f32[2,8,1], index: 4, kind: output, shape index: {2}]  }
   0x1 LB: > { %s2273_s16 = sadd.s32 4294967295, %s2378_s15   ;;  %p2277_p0 = scmp.ge.s32.totalorder %s2378_s15, 1  ;;  %s2378_s15 = sphi %s2414_s15, %s15_s15  }
   0x2   : > { %p167_p1 = scmp.lt.s32.totalorder %s2378_s15, 3 }
   0x4   : > { %p168_p2 = pnand %p2277_p0, %p167_p1 }
   0x5   : > { %p2424_p3 = scmp.lt.s32.totalorder (!%p168_p2), %s2273_s16, 1  ;;  %s2381_s22 = smov (!%p168_p2), 4  }
   0x6   : > { %171 = sbr.rel (%p168_p2) target bundleno = 1013 (0x3f5), region = 28  ;;  %s2382_s23 = smov (!%p168_p2), 8  }
   0x7   : > { %s2383_s24 = smov (!%p168_p2), 12   ;;  %s2384_s25 = smov (!%p168_p2), 16  }
   0x8   : > { %s2385_s26 = smov (!%p168_p2), 20   ;;  %s2386_s27 = smov (!%p168_p2), 24  }
   0x9   : > { %s2387_s28 = smov (!%p168_p2), 28   ;;  %s2388_s29 = smov (!%p168_p2), 32  }
   0xb   : > { %vm219_vm0 = vcmask 31744   ;;  %vm228_vm1 = vcmask 24576   ;;  %vm222_vm2 = vcmask 25600   ;;  %v2380_v0 = vmov 0.0   ;;  %s3541_s16 = smov (!%p2424_p3, %s2273_s16), 1 }
   0xc   : > { %220 = vst.msk [vmem:[#allocation2] sm:$0xff] %vm219_vm0, %v2380_v0  ;;  %221 = vst.msk [vmem:[#allocation2 + $0x8] sm:$0xff] %vm219_vm0, %v2380_v0  ;;  %s2319_s18 = sshll.u32 %s3541_s16, 8  ;;  %vm554_vm3 = vcmask 64544   ;;  %vm747_vm4 = vcmask 97344   ;;  %vm940_vm5 = vcmask 130144  }
   0xd   : > { %225 = vst.msk [vmem:[#allocation2 + $0x198] sm:$0xff] %vm219_vm0, %v2380_v0  ;;  %226 = vst.msk [vmem:[#allocation2 + $0x1a0] sm:$0xff] %vm219_vm0, %v2380_v0  ;;  %s2480_s21 = scalar_lea.vmem %s3534_s0, %s2319_s18  ;;  %vm1133_vm6 = vcmask 162944   ;;  %vm1326_vm7 = vcmask 195744   ;;  %vm1520_vm8 = vcmask 228544   ;;  %vm1713_vm9 = vcmask 261344  }
   0xe   : > { %230 = vst.msk [vmem:[#allocation2 + $0x18] sm:$0x1] %vm228_vm1, %v2380_v0  ;;  %231 = vst.msk [vmem:[#allocation2 + $0x30] sm:$0x1] %vm228_vm1, %v2380_v0  ;;  %v265_v1 = vld [vmem:[%s2480_s21] sm:$0xff]  ;;  %v266_v2 = vld [vmem:[%s2480_s21 + $0x8] sm:$0xff] }
   0xf   : > { %232 = vst.msk [vmem:[#allocation2 + $0x48] sm:$0x1] %vm228_vm1, %v2380_v0  ;;  %233 = vst.msk [vmem:[#allocation2 + $0x60] sm:$0x1] %vm228_vm1, %v2380_v0  ;;  %v267_v3 = vld [vmem:[%s2480_s21 + $0x10] sm:$0xff]  ;;  %v268_v4 = vld [vmem:[%s2480_s21 + $0x18] sm:$0xff] }
  0x10   : > { %234 = vst.msk [vmem:[#allocation2 + $0x78] sm:$0x1] %vm228_vm1, %v2380_v0  ;;  %235 = vst.msk [vmem:[#allocation2 + $0x90] sm:$0x1] %vm228_vm1, %v2380_v0  ;;  %v269_v5 = vld [vmem:[%s2480_s21 + $0x20] sm:$0xff]  ;;  %v270_v6 = vld [vmem:[%s2480_s21 + $0x28] sm:$0xff] }
  0x11   : > { %236 = vst.msk [vmem:[#allocation2 + $0xa8] sm:$0x1] %vm228_vm1, %v2380_v0  ;;  %237 = vst.msk [vmem:[#allocation2 + $0xc0] sm:$0x1] %vm228_vm1, %v2380_v0  ;;  %v271_v9 = vld [vmem:[%s2480_s21 + $0x30] sm:$0xff]  ;;  %v272_v10 = vld [vmem:[%s2480_s21 + $0x38] sm:$0xff] }
  0x12   : > { %238 = vst.msk [vmem:[#allocation2 + $0xd8] sm:$0x1] %vm228_vm1, %v2380_v0  ;;  %239 = vst.msk [vmem:[#allocation2 + $0xf0] sm:$0x1] %vm228_vm1, %v2380_v0  ;;  %v273_v11 = vld [vmem:[%s2480_s21 + $0x40] sm:$0xff]  ;;  %v274_v12 = vld [vmem:[%s2480_s21 + $0x48] sm:$0xff] }
  0x13   : > { %240 = vst.msk [vmem:[#allocation2 + $0x108] sm:$0x1] %vm228_vm1, %v2380_v0  ;;  %241 = vst.msk [vmem:[#allocation2 + $0x120] sm:$0x1] %vm228_vm1, %v2380_v0  ;;  %v394_v7 = vld [vmem:[#allocation2 + $0x1] sm:$0xff]  ;;  %v275_v13 = vld [vmem:[%s2480_s21 + $0x50] sm:$0xff] }
  0x14   : > { %242 = vst.msk [vmem:[#allocation2 + $0x138] sm:$0x1] %vm228_vm1, %v2380_v0  ;;  %243 = vst.msk [vmem:[#allocation2 + $0x150] sm:$0x1] %vm228_vm1, %v2380_v0  ;;  %458 = vrot.lane.b32.xlu0 %v394_v7, %s2381_s22  ;;  %v276_v14 = vld [vmem:[%s2480_s21 + $0x58] sm:$0xff]  ;;  %v277_v15 = vld [vmem:[%s2480_s21 + $0x60] sm:$0xff] }
  0x15   : > { %244 = vst.msk [vmem:[#allocation2 + $0x168] sm:$0x1] %vm228_vm1, %v2380_v0  ;;  %245 = vst.msk [vmem:[#allocation2 + $0x180] sm:$0x1] %vm228_vm1, %v2380_v0  ;;  %v278_v16 = vld [vmem:[%s2480_s21 + $0x68] sm:$0xff]  ;;  %v279_v17 = vld [vmem:[%s2480_s21 + $0x70] sm:$0xff] }
  0x16   : > { %248 = vst.msk [vmem:[#allocation2 + $0x29] sm:$0x1] %vm228_vm1, %v2380_v0  ;;  %249 = vst.msk [vmem:[#allocation2 + $0x41] sm:$0x1] %vm228_vm1, %v2380_v0  ;;  %v280_v18 = vld [vmem:[%s2480_s21 + $0x78] sm:$0xff]  ;;  %v281_v19 = vld [vmem:[%s2480_s21 + $0x80] sm:$0xff] }
  0x17   : > { %250 = vst.msk [vmem:[#allocation2 + $0x59] sm:$0x1] %vm228_vm1, %v2380_v0  ;;  %251 = vst.msk [vmem:[#allocation2 + $0x71] sm:$0x1] %vm228_vm1, %v2380_v0  ;;  %v282_v20 = vld [vmem:[%s2480_s21 + $0x88] sm:$0xff]  ;;  %v283_v21 = vld [vmem:[%s2480_s21 + $0x90] sm:$0xff] }
  0x18   : > { %252 = vst.msk [vmem:[#allocation2 + $0x89] sm:$0x1] %vm228_vm1, %v2380_v0  ;;  %253 = vst.msk [vmem:[#allocation2 + $0xa1] sm:$0x1] %vm228_vm1, %v2380_v0  ;;  %v284_v22 = vld [vmem:[%s2480_s21 + $0x98] sm:$0xff]  ;;  %v285_v23 = vld [vmem:[%s2480_s21 + $0xa0] sm:$0xff] }
  0x19   : > { %254 = vst.msk [vmem:[#allocation2 + $0xb9] sm:$0x1] %vm228_vm1, %v2380_v0  ;;  %255 = vst.msk [vmem:[#allocation2 + $0xd1] sm:$0x1] %vm228_vm1, %v2380_v0  ;;  %v286_v24 = vld [vmem:[%s2480_s21 + $0xa8] sm:$0xff]  ;;  %v287_v28 = vld [vmem:[%s2480_s21 + $0xb0] sm:$0xff] }
  0x1a   : > { %256 = vst.msk [vmem:[#allocation2 + $0xe9] sm:$0x1] %vm228_vm1, %v2380_v0  ;;  %257 = vst.msk [vmem:[#allocation2 + $0x101] sm:$0x1] %vm228_vm1, %v2380_v0  ;;  %v288_v29 = vld [vmem:[%s2480_s21 + $0xb8] sm:$0xff]  ;;  %v289_v33 = vld [vmem:[%s2480_s21 + $0xc0] sm:$0xff] }
  0x1b   : > { %258 = vst.msk [vmem:[#allocation2 + $0x119] sm:$0x1] %vm228_vm1, %v2380_v0  ;;  %259 = vst.msk [vmem:[#allocation2 + $0x131] sm:$0x1] %vm228_vm1, %v2380_v0  ;;  %v290_v34 = vld [vmem:[%s2480_s21 + $0xc8] sm:$0xff]  ;;  %v291_v35 = vld [vmem:[%s2480_s21 + $0xd0] sm:$0xff] }
  0x1c   : > { %260 = vst.msk [vmem:[#allocation2 + $0x149] sm:$0x1] %vm228_vm1, %v2380_v0  ;;  %261 = vst.msk [vmem:[#allocation2 + $0x161] sm:$0x1] %vm228_vm1, %v2380_v0  ;;  %v292_v36 = vld [vmem:[%s2480_s21 + $0xd8] sm:$0xff]  ;;  %v293_v37 = vld [vmem:[%s2480_s21 + $0xe0] sm:$0xff] }
  0x1d   : > { %262 = vst.msk [vmem:[#allocation2 + $0x179] sm:$0x1] %vm228_vm1, %v2380_v0  ;;  %263 = vst.msk [vmem:[#allocation2 + $0x191] sm:$0x1] %vm228_vm1, %v2380_v0  ;;  %v294_v38 = vld [vmem:[%s2480_s21 + $0xe8] sm:$0xff]  ;;  %v295_v57 = vld [vmem:[%s2480_s21 + $0xf0] sm:$0xff] }
  0x1e   : > { %223 = vst.msk [vmem:[#allocation2 + $0x10] sm:$0x3] %vm222_vm2, %v2380_v0  ;;  %227 = vst.msk [vmem:[#allocation2 + $0x1a8] sm:$0x3] %vm222_vm2, %v2380_v0  ;;  %v331_v48 = vld [vmem:[#allocation2 + $0x8] sm:$0xff]  ;;  %v296_v58 = vld [vmem:[%s2480_s21 + $0xf8] sm:$0xff] }
  0x1f   : > { %229 = vst.msk [vmem:[#allocation2] sm:$0x1] %vm228_vm1, %v2380_v0  ;;  %246 = vst.msk [vmem:[#allocation2 + $0x198] sm:$0x1] %vm228_vm1, %v2380_v0  ;;  %vm1906_vm10 = vcmask 294144   ;;  %vm1972_vm11 = vcmask 293888  }
  0x20   : > { %247 = vst.msk [vmem:[#allocation2 + $0x11] sm:$0x1] %vm228_vm1, %v2380_v0  ;;  %264 = vst.msk [vmem:[#allocation2 + $0x1a9] sm:$0x1] %vm228_vm1, %v2380_v0  ;;  %s2320_s6 = sshll.u32 %s3541_s16, 4  ;;  %s2282_s10 = sshll.u32 %s3541_s16, 3 }
  0x21   : > { %298 = vst.msk [vmem:[#allocation2 + $0x19] sm:$0xff] %vm219_vm0, %v265_v1  ;;  %299 = vst.msk [vmem:[#allocation2 + $0x21] sm:$0xff] %vm219_vm0, %v266_v2  ;;  %s210_s9 = scalar_lea.vmem %s3536_s2, %s2320_s6  ;;  %s214_s13 = scalar_lea.vmem %s3537_s3, %s2282_s10  ;;  %vm2148_vm12 = vcmask 7168  }
  0x22   : > { %300 = vst.msk [vmem:[#allocation2 + $0x31] sm:$0xff] %vm219_vm0, %v267_v3  ;;  %301 = vst.msk [vmem:[#allocation2 + $0x39] sm:$0xff] %vm219_vm0, %v268_v4  ;;  %s218_s18 = scalar_lea.vmem %s3538_s4, %s2282_s10 }
  0x23   : > { %302 = vst.msk [vmem:[#allocation2 + $0x49] sm:$0xff] %vm219_vm0, %v269_v5  ;;  %303 = vst.msk [vmem:[#allocation2 + $0x51] sm:$0xff] %vm219_vm0, %v270_v6 }
  0x24   : > { %304 = vst.msk [vmem:[#allocation2 + $0x61] sm:$0xff] %vm219_vm0, %v271_v9  ;;  %305 = vst.msk [vmem:[#allocation2 + $0x69] sm:$0xff] %vm219_vm0, %v272_v10 }
  0x25   : > { %v395_v8 = vld [vmem:[#allocation2 + $0x9] sm:$0xff]  ;;  %306 = vst.msk [vmem:[#allocation2 + $0x79] sm:$0xff] %vm219_vm0, %v273_v11  ;;  %307 = vst.msk [vmem:[#allocation2 + $0x81] sm:$0xff] %vm219_vm0, %v274_v12 }
  0x26   : > { %308 = vst.msk [vmem:[#allocation2 + $0x91] sm:$0xff] %vm219_vm0, %v275_v13  ;;  %309 = vst.msk [vmem:[#allocation2 + $0x99] sm:$0xff] %vm219_vm0, %v276_v14  ;;  %460 = vrot.lane.b32.xlu0 %v395_v8, %s2381_s22  ;;  %v330_v45 = vld [vmem:[#allocation2] sm:$0xff] }
  0x27   : > { %310 = vst.msk [vmem:[#allocation2 + $0xa9] sm:$0xff] %vm219_vm0, %v277_v15  ;;  %311 = vst.msk [vmem:[#allocation2 + $0xb1] sm:$0xff] %vm219_vm0, %v278_v16 }
  0x28   : > { %312 = vst.msk [vmem:[#allocation2 + $0xc1] sm:$0xff] %vm219_vm0, %v279_v17  ;;  %313 = vst.msk [vmem:[#allocation2 + $0xc9] sm:$0xff] %vm219_vm0, %v280_v18  ;;  %v396_v25 = vld [vmem:[#allocation2 + $0x19] sm:$0xff]  ;;  %v397_v27 = vld [vmem:[#allocation2 + $0x21] sm:$0xff] }
  0x29   : > { %314 = vst.msk [vmem:[#allocation2 + $0xd9] sm:$0xff] %vm219_vm0, %v281_v19  ;;  %315 = vst.msk [vmem:[#allocation2 + $0xe1] sm:$0xff] %vm219_vm0, %v282_v20  ;;  %v398_v26 = vld [vmem:[#allocation2 + $0x31] sm:$0xff]  ;;  %462 = vrot.lane.b32.xlu1 %v396_v25, %s2381_s22  ;;  %v399_v31 = vld [vmem:[#allocation2 + $0x39] sm:$0xff] }
  0x2a   : > { %316 = vst.msk [vmem:[#allocation2 + $0xf1] sm:$0xff] %vm219_vm0, %v283_v21  ;;  %317 = vst.msk [vmem:[#allocation2 + $0xf9] sm:$0xff] %vm219_vm0, %v284_v22  ;;  %466 = vrot.lane.b32.xlu0 %v398_v26, %s2381_s22  ;;  %v400_v30 = vld [vmem:[#allocation2 + $0x49] sm:$0xff]  ;;  %v401_v39 = vld [vmem:[#allocation2 + $0x51] sm:$0xff] }
  0x2b   : > { %318 = vst.msk [vmem:[#allocation2 + $0x109] sm:$0xff] %vm219_vm0, %v285_v23  ;;  %319 = vst.msk [vmem:[#allocation2 + $0x111] sm:$0xff] %vm219_vm0, %v286_v24  ;;  %v402_v32 = vld [vmem:[#allocation2 + $0x61] sm:$0xff]  ;;  %v403_v41 = vld [vmem:[#allocation2 + $0x69] sm:$0xff] }
  0x2c   : > { %320 = vst.msk [vmem:[#allocation2 + $0x121] sm:$0xff] %vm219_vm0, %v287_v28  ;;  %321 = vst.msk [vmem:[#allocation2 + $0x129] sm:$0xff] %vm219_vm0, %v288_v29  ;;  %v404_v40 = vld [vmem:[#allocation2 + $0x79] sm:$0xff]  ;;  %v405_v43 = vld [vmem:[#allocation2 + $0x81] sm:$0xff] }
  0x2d   : > { %464 = vrot.lane.b32.xlu1 %v397_v27, %s2381_s22  ;;  %322 = vst.msk [vmem:[#allocation2 + $0x139] sm:$0xff] %vm219_vm0, %v289_v33  ;;  %323 = vst.msk [vmem:[#allocation2 + $0x141] sm:$0xff] %vm219_vm0, %v290_v34  ;;  %v2552_v42 = vld [vmem:[#allocation2 + $0x91] sm:$0xff]  ;;  %v2560_v47 = vld [vmem:[#allocation2 + $0x99] sm:$0xff] }
  0x2e   : > { %470 = vrot.lane.b32.xlu0 %v400_v30, %s2381_s22  ;;  %324 = vst.msk [vmem:[#allocation2 + $0x151] sm:$0xff] %vm219_vm0, %v291_v35  ;;  %325 = vst.msk [vmem:[#allocation2 + $0x159] sm:$0xff] %vm219_vm0, %v292_v36  ;;  %v2557_v44 = vld [vmem:[#allocation2 + $0xa9] sm:$0xff]  ;;  %v332_v46 = vld [vmem:[#allocation2 + $0x18] sm:$0xff] }
  0x2f   : > { %326 = vst.msk [vmem:[#allocation2 + $0x169] sm:$0xff] %vm219_vm0, %v293_v37  ;;  %327 = vst.msk [vmem:[#allocation2 + $0x171] sm:$0xff] %vm219_vm0, %v294_v38  ;;  %v333_v49 = vld [vmem:[#allocation2 + $0x20] sm:$0xff]  ;;  %v334_v51 = vld [vmem:[#allocation2 + $0x30] sm:$0xff] }
  0x30   : > { %362 = vst.msk [vmem:[#allocation3] sm:$0xff] %vm219_vm0, %v330_v45  ;;  %364 = vst.msk [vmem:[#allocation3 + $0x10] sm:$0xff] %vm219_vm0, %v332_v46  ;;  %v2567_v50 = vld [vmem:[#allocation2 + $0xc1] sm:$0xff]  ;;  %v335_v52 = vld [vmem:[#allocation2 + $0x38] sm:$0xff] }
  0x31   : > { %468 = vrot.lane.b32.xlu1 %v399_v31, %s2381_s22  ;;  %363 = vst.msk [vmem:[#allocation3 + $0x8] sm:$0xff] %vm219_vm0, %v331_v48  ;;  %365 = vst.msk [vmem:[#allocation3 + $0x18] sm:$0xff] %vm219_vm0, %v333_v49  ;;  %v2572_v53 = vld [vmem:[#allocation2 + $0xb1] sm:$0xff]  ;;  %v336_v54 = vld [vmem:[#allocation2 + $0x48] sm:$0xff] }
  0x32   : > { %474 = vrot.lane.b32.xlu0 %v402_v32, %s2381_s22  ;;  %366 = vst.msk [vmem:[#allocation3 + $0x20] sm:$0xff] %vm219_vm0, %v334_v51  ;;  %367 = vst.msk [vmem:[#allocation3 + $0x28] sm:$0xff] %vm219_vm0, %v335_v52  ;;  %v337_v55 = vld [vmem:[#allocation2 + $0x50] sm:$0xff]  ;;  %v2576_v56 = vld [vmem:[#allocation2 + $0xd9] sm:$0xff] }
  0x33   : > { %368 = vst.msk [vmem:[#allocation3 + $0x30] sm:$0xff] %vm219_vm0, %v336_v54  ;;  %369 = vst.msk [vmem:[#allocation3 + $0x38] sm:$0xff] %vm219_vm0, %v337_v55  ;;  %v2582_v59 = vld [vmem:[#allocation2 + $0xc8] sm:$0xff]  ;;  %v2588_v60 = vld [vmem:[#allocation2 + $0x60] sm:$0xff] }
  0x34   : > { %328 = vst.msk [vmem:[#allocation2 + $0x181] sm:$0xff] %vm219_vm0, %v295_v57  ;;  %329 = vst.msk [vmem:[#allocation2 + $0x189] sm:$0xff] %vm219_vm0, %v296_v58  ;;  %v2590_v61 = vld [vmem:[#allocation2 + $0x68] sm:$0xff]  ;;  %v2592_v62 = vld [vmem:[#allocation2 + $0x78] sm:$0xff] }
  0x35   : > { %472 = vrot.lane.b32.xlu1 %v401_v39, %s2381_s22  ;;  %379 = vst.msk [vmem:[#allocation3 + $0x88] sm:$0xff] %vm219_vm0, %v2582_v59  ;;  %370 = vst.msk [vmem:[#allocation3 + $0x40] sm:$0xff] %vm219_vm0, %v2588_v60  ;;  %v2602_v63 = vld [vmem:[#allocation2 + $0x80] sm:$0xff]  ;;  %v2604_v0 = vld [vmem:[#allocation2 + $0x90] sm:$0xff] }
  0x36   : > { %478 = vrot.lane.b32.xlu0 %v404_v40, %s2381_s22  ;;  %371 = vst.msk [vmem:[#allocation3 + $0x48] sm:$0xff] %vm219_vm0, %v2590_v61  ;;  %372 = vst.msk [vmem:[#allocation3 + $0x50] sm:$0xff] %vm219_vm0, %v2592_v62  ;;  %v2606_v1 = vld [vmem:[#allocation2 + $0x98] sm:$0xff]  ;;  %v2616_v2 = vld [vmem:[#allocation2 + $0xa8] sm:$0xff] }
  0x37   : > { %373 = vst.msk [vmem:[#allocation3 + $0x58] sm:$0xff] %vm219_vm0, %v2602_v63  ;;  %374 = vst.msk [vmem:[#allocation3 + $0x60] sm:$0xff] %vm219_vm0, %v2604_v0  ;;  %v2618_v3 = vld [vmem:[#allocation2 + $0xb0] sm:$0xff]  ;;  %v2626_v5 = vld [vmem:[#allocation2 + $0xe0] sm:$0xff] }
  0x38   : > { %375 = vst.msk [vmem:[#allocation3 + $0x68] sm:$0xff] %vm219_vm0, %v2606_v1  ;;  %v2620_v4 = vld [vmem:[#allocation2 + $0xc9] sm:$0xff]  ;;  %376 = vst.msk [vmem:[#allocation3 + $0x70] sm:$0xff] %vm219_vm0, %v2616_v2  ;;  %v2628_v6 = vld [vmem:[#allocation2 + $0xc0] sm:$0xff] }
  0x39   : > { %476 = vrot.lane.b32.xlu1 %v403_v41, %s2381_s22  ;;  %377 = vst.msk [vmem:[#allocation3 + $0x78] sm:$0xff] %vm219_vm0, %v2618_v3  ;;  %v414_v7 = vld [vmem:[#allocation2 + $0xf1] sm:$0xff]  ;;  %378 = vst.msk [vmem:[#allocation3 + $0x80] sm:$0xff] %vm219_vm0, %v2628_v6  ;;  %v2641_v11 = vld [vmem:[#allocation2 + $0x108] sm:$0xff] }
  0x3a   : > { %482 = vrot.lane.b32.xlu0 %v2552_v42, %s2381_s22  ;;  %v2634_v8 = vld [vmem:[#allocation2 + $0xd8] sm:$0xff]  ;;  %381 = vst.msk [vmem:[#allocation3 + $0x98] sm:$0xff] %vm219_vm0, %v2626_v5  ;;  %v350_v9 = vld [vmem:[#allocation2 + $0xf0] sm:$0xff]  ;;  %384 = vst.msk [vmem:[#allocation3 + $0xb0] sm:$0xff] %vm219_vm0, %v2641_v11 }
  0x3b   : > { %380 = vst.msk [vmem:[#allocation3 + $0x90] sm:$0xff] %vm219_vm0, %v2634_v8  ;;  %382 = vst.msk [vmem:[#allocation3 + $0xa0] sm:$0xff] %vm219_vm0, %v350_v9  ;;  %v351_v10 = vld [vmem:[#allocation2 + $0xf8] sm:$0xff]  ;;  %v2643_v12 = vld [vmem:[#allocation2 + $0x110] sm:$0xff] }
  0x3c   : > { %383 = vst.msk [vmem:[#allocation3 + $0xa8] sm:$0xff] %vm219_vm0, %v351_v10  ;;  %385 = vst.msk [vmem:[#allocation3 + $0xb8] sm:$0xff] %vm219_vm0, %v2643_v12  ;;  %v2652_v13 = vld [vmem:[#allocation2 + $0x120] sm:$0xff]  ;;  %v2654_v14 = vld [vmem:[#allocation2 + $0x128] sm:$0xff] }
  0x3d   : > { %480 = vrot.lane.b32.xlu1 %v405_v43, %s2381_s22  ;;  %v2656_v15 = vld [vmem:[#allocation2 + $0xe1] sm:$0xff]  ;;  %386 = vst.msk [vmem:[#allocation3 + $0xc0] sm:$0xff] %vm219_vm0, %v2652_v13  ;;  %387 = vst.msk [vmem:[#allocation3 + $0xc8] sm:$0xff] %vm219_vm0, %v2654_v14  ;;  %v416_v16 = vld [vmem:[#allocation2 + $0x109] sm:$0xff] }
  0x3e   : > { %486 = vrot.lane.b32.xlu0 %v2557_v44, %s2381_s22  ;;  %v2663_v17 = vld [vmem:[#allocation2 + $0x170] sm:$0xff]  ;;  %v2667_v18 = vld [vmem:[#allocation2 + $0x138] sm:$0xff]  ;;  %v2669_v19 = vld [vmem:[#allocation2 + $0x140] sm:$0xff] }
  0x3f   : > { %393 = vst.msk [vmem:[#allocation3 + $0xf8] sm:$0xff] %vm219_vm0, %v2663_v17  ;;  %v415_v20 = vld [vmem:[#allocation2 + $0xf9] sm:$0xff]  ;;  %388 = vst.msk [vmem:[#allocation3 + $0xd0] sm:$0xff] %vm219_vm0, %v2667_v18  ;;  %v418_v21 = vld [vmem:[#allocation2 + $0x121] sm:$0xff] }
  0x40   : > { %389 = vst.msk [vmem:[#allocation3 + $0xd8] sm:$0xff] %vm219_vm0, %v2669_v19  ;;  %v2679_v22 = vld [vmem:[#allocation2 + $0x150] sm:$0xff]  ;;  %v2681_v23 = vld [vmem:[#allocation2 + $0x158] sm:$0xff]  ;;  %v2689_v26 = vld [vmem:[#allocation2 + $0x168] sm:$0xff] }
  0x41   : > { %484 = vrot.lane.b32.xlu1 %v2560_v47, %s2381_s22  ;;  %v417_v24 = vld [vmem:[#allocation2 + $0x111] sm:$0xff]  ;;  %390 = vst.msk [vmem:[#allocation3 + $0xe0] sm:$0xff] %vm219_vm0, %v2679_v22  ;;  %391 = vst.msk [vmem:[#allocation3 + $0xe8] sm:$0xff] %vm219_vm0, %v2681_v23  ;;  %v420_v25 = vld [vmem:[#allocation2 + $0x139] sm:$0xff] }
  0x42   : > { %490 = vrot.lane.b32.xlu0 %v2567_v50, %s2381_s22  ;;  %v419_v27 = vld [vmem:[#allocation2 + $0x129] sm:$0xff]  ;;  %392 = vst.msk [vmem:[#allocation3 + $0xf0] sm:$0xff] %vm219_vm0, %v2689_v26  ;;  %v2694_v28 = vld [vmem:[#allocation2 + $0x151] sm:$0xff]  ;;  %v2697_v29 = vld [vmem:[#allocation2 + $0x141] sm:$0xff] }
  0x43   : > { %v2701_v30 = vld [vmem:[#allocation2 + $0x169] sm:$0xff]  ;;  %v2705_v31 = vld [vmem:[#allocation2 + $0x159] sm:$0xff]  ;;  %v2711_v33 = vld [vmem:[#allocation2 + $0x171] sm:$0xff] }
  0x44   : > { %v587_v32 = vld [vmem:[#allocation2 + $0x2] sm:$0xff]  ;;  %v589_v34 = vld [vmem:[#allocation2 + $0x1a] sm:$0xff]  ;;  %v588_v35 = vld [vmem:[#allocation2 + $0xa] sm:$0xff] }
  0x45   : > { %488 = vrot.lane.b32.xlu1 %v2572_v53, %s2381_s22  ;;  %v591_v36 = vld [vmem:[#allocation2 + $0x32] sm:$0xff]  ;;  %v590_v37 = vld [vmem:[#allocation2 + $0x22] sm:$0xff]  ;;  %v593_v38 = vld [vmem:[#allocation2 + $0x4a] sm:$0xff] }
  0x46   : > { %494 = vrot.lane.b32.xlu0 %v2576_v56, %s2381_s22  ;;  %v592_v39 = vld [vmem:[#allocation2 + $0x3a] sm:$0xff]  ;;  %v595_v40 = vld [vmem:[#allocation2 + $0x62] sm:$0xff]  ;;  %v594_v41 = vld [vmem:[#allocation2 + $0x52] sm:$0xff] }
  0x47   : > { %v2723_v43 = vld [vmem:[#allocation2 + $0x7a] sm:$0xff]  ;;  %v596_v45 = vld [vmem:[#allocation2 + $0x6a] sm:$0xff]  ;;  %v2728_v46 = vld [vmem:[#allocation2 + $0x92] sm:$0xff] }
  0x48   : > { %v2731_v48 = vld [vmem:[#allocation2 + $0x82] sm:$0xff]  ;;  %v2735_v49 = vld [vmem:[#allocation2 + $0xaa] sm:$0xff]  ;;  %v2739_v51 = vld [vmem:[#allocation2 + $0x9a] sm:$0xff] }
  0x49   : > { %492 = vrot.lane.b32.xlu1 %v2620_v4, %s2381_s22  ;;  %v2743_v52 = vld [vmem:[#allocation2 + $0xc2] sm:$0xff]  ;;  %v2747_v54 = vld [vmem:[#allocation2 + $0xb2] sm:$0xff]  ;;  %v2751_v55 = vld [vmem:[#allocation2 + $0xda] sm:$0xff] }
  0x4a   : > { %498 = vrot.lane.b32.xlu0 %v414_v7, %s2381_s22  ;;  %v2755_v57 = vld [vmem:[#allocation2 + $0xca] sm:$0xff]  ;;  %v607_v58 = vld [vmem:[#allocation2 + $0xf2] sm:$0xff]  ;;  %v2761_v7 = vld [vmem:[#allocation2 + $0xe2] sm:$0xff] }
  0x4b   : > { %v609_v9 = vld [vmem:[#allocation2 + $0x10a] sm:$0xff]  ;;  %v608_v10 = vld [vmem:[#allocation2 + $0xfa] sm:$0xff] }
  0x4d   : > { %496 = vrot.lane.b32.xlu1 %v2656_v15, %s2381_s22 }
  0x4e   : > { %502 = vrot.lane.b32.xlu0 %v416_v16, %s2381_s22  ;;  %v611_v16 = vld [vmem:[#allocation2 + $0x122] sm:$0xff] }
  0x51   : > { %500 = vrot.lane.b32.xlu1 %v415_v20, %s2381_s22  ;;  %v610_v20 = vld [vmem:[#allocation2 + $0x112] sm:$0xff] }
  0x52   : > { %506 = vrot.lane.b32.xlu0 %v418_v21, %s2381_s22  ;;  %v2769_v21 = vld [vmem:[#allocation2 + $0x13a] sm:$0xff] }
  0x55   : > { %504 = vrot.lane.b32.xlu1 %v417_v24, %s2381_s22 }
  0x56   : > { %510 = vrot.lane.b32.xlu0 %v420_v25, %s2381_s22  ;;  %v612_v25 = vld [vmem:[#allocation2 + $0x12a] sm:$0xff] }
  0x59   : > { %508 = vrot.lane.b32.xlu1 %v419_v27, %s2381_s22  ;;  %v2775_v27 = vld [vmem:[#allocation2 + $0x152] sm:$0xff] }
  0x5a   : > { %514 = vrot.lane.b32.xlu0 %v2694_v28, %s2381_s22 }
  0x5d   : > { %512 = vrot.lane.b32.xlu1 %v2697_v29, %s2381_s22 }
  0x5e   : > { %518 = vrot.lane.b32.xlu0 %v2701_v30, %s2381_s22 }
  0x61   : > { %516 = vrot.lane.b32.xlu1 %v2705_v31, %s2381_s22 }
  0x62   : > { %651 = vrot.lane.b32.xlu0 %v587_v32, %s2382_s23 }
  0x65   : > { %520 = vrot.lane.b32.xlu1 %v2711_v33, %s2381_s22 }
  0x66   : > { %655 = vrot.lane.b32.xlu0 %v589_v34, %s2382_s23  ;;  %v2778_v34 = vld [vmem:[#allocation2 + $0x142] sm:$0xff] }
  0x69   : > { %653 = vrot.lane.b32.xlu1 %v588_v35, %s2382_s23 }
  0x6a   : > { %659 = vrot.lane.b32.xlu0 %v591_v36, %s2382_s23  ;;  %v2784_v36 = vld [vmem:[#allocation2 + $0x16a] sm:$0xff] }
  0x6d   : > { %657 = vrot.lane.b32.xlu1 %v590_v37, %s2382_s23 }
  0x6e   : > { %663 = vrot.lane.b32.xlu0 %v593_v38, %s2382_s23  ;;  %v2788_v38 = vld [vmem:[#allocation2 + $0x15a] sm:$0xff] }
  0x71   : > { %661 = vrot.lane.b32.xlu1 %v592_v39, %s2382_s23 }
  0x72   : > { %667 = vrot.lane.b32.xlu0 %v595_v40, %s2382_s23  ;;  %v2794_v40 = vld [vmem:[#allocation2 + $0x188] sm:$0xff] }
  0x75   : > { %665 = vrot.lane.b32.xlu1 %v594_v41, %s2382_s23 }
  0x76   : > { %671 = vrot.lane.b32.xlu0 %v2723_v43, %s2382_s23 }
  0x79   : > { %669 = vrot.lane.b32.xlu1 %v596_v45, %s2382_s23  ;;  %v2798_v45 = vld [vmem:[#allocation2 + $0x172] sm:$0xff] }
  0x7a   : > { %675 = vrot.lane.b32.xlu0 %v2728_v46, %s2382_s23 }
  0x7d   : > { %673 = vrot.lane.b32.xlu1 %v2731_v48, %s2382_s23 }
  0x7e   : > { %679 = vrot.lane.b32.xlu0 %v2735_v49, %s2382_s23 }
  0x81   : > { %677 = vrot.lane.b32.xlu1 %v2739_v51, %s2382_s23 }
  0x82   : > { %683 = vrot.lane.b32.xlu0 %v2743_v52, %s2382_s23 }
  0x85   : > { %681 = vrot.lane.b32.xlu1 %v2747_v54, %s2382_s23 }
  0x86   : > { %687 = vrot.lane.b32.xlu0 %v2751_v55, %s2382_s23  ;;  %v459_v24 = vpop.permute.xlu0 %458 }
  0x87   : > { %555 = vst.msk [vmem:[#allocation3] sm:$0xff] %vm554_vm3, %v459_v24 }
  0x89   : > { %685 = vrot.lane.b32.xlu1 %v2755_v57, %s2382_s23 }
  0x8a   : > { %691 = vrot.lane.b32.xlu0 %v607_v58, %s2382_s23 }
  0x8d   : > { %689 = vrot.lane.b32.xlu1 %v2761_v7, %s2382_s23 }
  0x8e   : > { %695 = vrot.lane.b32.xlu0 %v609_v9, %s2382_s23  ;;  %v2804_v9 = vld [vmem:[#allocation2 + $0x189] sm:$0xff] }
  0x91   : > { %693 = vrot.lane.b32.xlu1 %v608_v10, %s2382_s23 }
  0x92   : > { %699 = vrot.lane.b32.xlu0 %v611_v16, %s2382_s23 }
  0x95   : > { %697 = vrot.lane.b32.xlu1 %v610_v20, %s2382_s23  ;;  %v2812_v20 = vld [vmem:[#allocation2 + $0x18a] sm:$0xff] }
  0x96   : > { %703 = vrot.lane.b32.xlu0 %v2769_v21, %s2382_s23 }
  0x98   : > { %v461_v32 = vpop.permute.xlu0 %460 }
  0x99   : > { %701 = vrot.lane.b32.xlu1 %v612_v25, %s2382_s23  ;;  %556 = vst.msk [vmem:[#allocation3 + $0x8] sm:$0xff] %vm554_vm3, %v461_v32  ;;  %v1391_v32 = vld [vmem:[#allocation2 + $0x1a0] sm:$0xff] }
  0x9a   : > { %707 = vrot.lane.b32.xlu0 %v2775_v27, %s2382_s23 }
  0x9b   : > { %v463_v35 = vpop.permute.xlu1 %462 }
  0x9c   : > { %557 = vst.msk [vmem:[#allocation3 + $0x10] sm:$0xff] %vm554_vm3, %v463_v35  ;;  %v467_v37 = vpop.permute.xlu0 %466 }
  0x9d   : > { %705 = vrot.lane.b32.xlu1 %v2778_v34, %s2382_s23  ;;  %559 = vst.msk [vmem:[#allocation3 + $0x20] sm:$0xff] %vm554_vm3, %v467_v37 }
  0x9e   : > { %711 = vrot.lane.b32.xlu0 %v2784_v36, %s2382_s23 }
  0x9f   : > { %v465_v39 = vpop.permute.xlu1 %464 }
  0xa0   : > { %558 = vst.msk [vmem:[#allocation3 + $0x18] sm:$0xff] %vm554_vm3, %v465_v39  ;;  %v471_v41 = vpop.permute.xlu0 %470 }
  0xa1   : > { %709 = vrot.lane.b32.xlu1 %v2788_v38, %s2382_s23  ;;  %561 = vst.msk [vmem:[#allocation3 + $0x30] sm:$0xff] %vm554_vm3, %v471_v41  ;;  %v2827_v41 = vld [vmem:[#allocation2 + $0x180] sm:$0xff] }
  0xa2   : > { %906 = vrot.lane.b32.xlu0 %v2794_v40, %s2383_s24 }
  0xa3   : > { %v469_v58 = vpop.permute.xlu1 %468 }
  0xa4   : > { %560 = vst.msk [vmem:[#allocation3 + $0x28] sm:$0xff] %vm554_vm3, %v469_v58  ;;  %v475_v10 = vpop.permute.xlu0 %474 }
  0xa5   : > { %713 = vrot.lane.b32.xlu1 %v2798_v45, %s2382_s23  ;;  %563 = vst.msk [vmem:[#allocation3 + $0x40] sm:$0xff] %vm554_vm3, %v475_v10 }
  0xa6   : > { %1099 = vrot.lane.b32.xlu0 %v2804_v9, %s2384_s25 }
  0xa7   : > { %v473_v16 = vpop.permute.xlu1 %472 }
  0xa8   : > { %562 = vst.msk [vmem:[#allocation3 + $0x38] sm:$0xff] %vm554_vm3, %v473_v16  ;;  %v479_v24 = vpop.permute.xlu0 %478  ;;  %v1584_v16 = vld [vmem:[#allocation2 + $0x1a1] sm:$0xff] }
  0xa9   : > { %874 = vrot.lane.b32.xlu1 %v2582_v59, %s2383_s24  ;;  %565 = vst.msk [vmem:[#allocation3 + $0x50] sm:$0xff] %vm554_vm3, %v479_v24 }
  0xaa   : > { %1292 = vrot.lane.b32.xlu0 %v2812_v20, %s2385_s26 }
  0xab   : > { %v477_v25 = vpop.permute.xlu1 %476 }
  0xac   : > { %564 = vst.msk [vmem:[#allocation3 + $0x48] sm:$0xff] %vm554_vm3, %v477_v25  ;;  %v483_v35 = vpop.permute.xlu0 %482 }
  0xad   : > { %1067 = vrot.lane.b32.xlu1 %v2620_v4, %s2384_s25  ;;  %567 = vst.msk [vmem:[#allocation3 + $0x60] sm:$0xff] %vm554_vm3, %v483_v35 }
  0xae   : > { %1486 = vrot.lane.b32.xlu0 %v1391_v32, %s2386_s27 }
  0xaf   : > { %v481_v37 = vpop.permute.xlu1 %480 }
  0xb0   : > { %566 = vst.msk [vmem:[#allocation3 + $0x58] sm:$0xff] %vm554_vm3, %v481_v37  ;;  %v487_v39 = vpop.permute.xlu0 %486  ;;  %v1777_v37 = vld [vmem:[#allocation2 + $0x1a2] sm:$0xff] }
  0xb1   : > { %1260 = vrot.lane.b32.xlu1 %v2755_v57, %s2385_s26  ;;  %569 = vst.msk [vmem:[#allocation3 + $0x70] sm:$0xff] %vm554_vm3, %v487_v39 }
  0xb2   : > { %1454 = vrot.lane.b32.xlu0 %v2626_v5, %s2386_s27  ;;  %v2840_v5 = vld [vmem:[#allocation2 + $0x181] sm:$0xff] }
  0xb3   : > { %v485_v58 = vpop.permute.xlu1 %484 }
  0xb4   : > { %568 = vst.msk [vmem:[#allocation3 + $0x68] sm:$0xff] %vm554_vm3, %v485_v58  ;;  %v491_v10 = vpop.permute.xlu0 %490 }
  0xb5   : > { %904 = vrot.lane.b32.xlu1 %v2827_v41, %s2383_s24  ;;  %571 = vst.msk [vmem:[#allocation3 + $0x80] sm:$0xff] %vm554_vm3, %v491_v10 }
  0xb6   : > { %872 = vrot.lane.b32.xlu0 %v2628_v6, %s2383_s24 }
  0xb7   : > { %v489_v24 = vpop.permute.xlu1 %488 }
  0xb8   : > { %570 = vst.msk [vmem:[#allocation3 + $0x78] sm:$0xff] %vm554_vm3, %v489_v24  ;;  %v495_v25 = vpop.permute.xlu0 %494 }
  0xb9   : > { %1679 = vrot.lane.b32.xlu1 %v1584_v16, %s2387_s28  ;;  %573 = vst.msk [vmem:[#allocation3 + $0x90] sm:$0xff] %vm554_vm3, %v495_v25  ;;  %v1390_v16 = vld [vmem:[#allocation2 + $0x198] sm:$0xff] }
  0xba   : > { %1647 = vrot.lane.b32.xlu0 %v2656_v15, %s2387_s28  ;;  %v2853_v15 = vld [vmem:[#allocation2 + $0x182] sm:$0xff] }
  0xbb   : > { %v493_v32 = vpop.permute.xlu1 %492 }
  0xbc   : > { %572 = vst.msk [vmem:[#allocation3 + $0x88] sm:$0xff] %vm554_vm3, %v493_v32  ;;  %v499_v35 = vpop.permute.xlu0 %498 }
  0xbd   : > { %1097 = vrot.lane.b32.xlu1 %v2840_v5, %s2384_s25  ;;  %575 = vst.msk [vmem:[#allocation3 + $0xa0] sm:$0xff] %vm554_vm3, %v499_v35 }
  0xbe   : > { %1065 = vrot.lane.b32.xlu0 %v2567_v50, %s2384_s25 }
  0xbf   : > { %v497_v39 = vpop.permute.xlu1 %496 }
  0xc0   : > { %574 = vst.msk [vmem:[#allocation3 + $0x98] sm:$0xff] %vm554_vm3, %v497_v39  ;;  %v503_v58 = vpop.permute.xlu0 %502 }
  0xc1   : > { %1872 = vrot.lane.b32.xlu1 %v1777_v37, %s2388_s29  ;;  %577 = vst.msk [vmem:[#allocation3 + $0xb0] sm:$0xff] %vm554_vm3, %v503_v58  ;;  %v1583_v37 = vld [vmem:[#allocation2 + $0x199] sm:$0xff] }
  0xc2   : > { %1840 = vrot.lane.b32.xlu0 %v2761_v7, %s2388_s29 }
  0xc3   : > { %v501_v10 = vpop.permute.xlu1 %500 }
  0xc4   : > { %576 = vst.msk [vmem:[#allocation3 + $0xa8] sm:$0xff] %vm554_vm3, %v501_v10  ;;  %v507_v24 = vpop.permute.xlu0 %506 }
  0xc5   : > { %1290 = vrot.lane.b32.xlu1 %v2853_v15, %s2385_s26  ;;  %579 = vst.msk [vmem:[#allocation3 + $0xc0] sm:$0xff] %vm554_vm3, %v507_v24 }
  0xc6   : > { %1484 = vrot.lane.b32.xlu0 %v1390_v16, %s2386_s27  ;;  %v1776_v16 = vld [vmem:[#allocation2 + $0x19a] sm:$0xff] }
  0xc7   : > { %v505_v25 = vpop.permute.xlu1 %504 }
  0xc8   : > { %578 = vst.msk [vmem:[#allocation3 + $0xb8] sm:$0xff] %vm554_vm3, %v505_v25  ;;  %v511_v32 = vpop.permute.xlu0 %510 }
  0xc9   : > { %1258 = vrot.lane.b32.xlu1 %v2743_v52, %s2385_s26  ;;  %581 = vst.msk [vmem:[#allocation3 + $0xd0] sm:$0xff] %vm554_vm3, %v511_v32 }
  0xca   : > { %1452 = vrot.lane.b32.xlu0 %v2634_v8, %s2386_s27 }
  0xcb   : > { %v509_v7 = vpop.permute.xlu1 %508 }
  0xcc   : > { %580 = vst.msk [vmem:[#allocation3 + $0xc8] sm:$0xff] %vm554_vm3, %v509_v7  ;;  %v515_v35 = vpop.permute.xlu0 %514 }
  0xcd   : > { %902 = vrot.lane.b32.xlu1 %v2663_v17, %s2383_s24  ;;  %583 = vst.msk [vmem:[#allocation3 + $0xe0] sm:$0xff] %vm554_vm3, %v515_v35 }
  0xce   : > { %870 = vrot.lane.b32.xlu0 %v2618_v3, %s2383_s24 }
  0xcf   : > { %v513_v39 = vpop.permute.xlu1 %512 }
  0xd0   : > { %582 = vst.msk [vmem:[#allocation3 + $0xd8] sm:$0xff] %vm554_vm3, %v513_v39  ;;  %v519_v58 = vpop.permute.xlu0 %518 }
  0xd1   : > { %1677 = vrot.lane.b32.xlu1 %v1583_v37, %s2387_s28  ;;  %585 = vst.msk [vmem:[#allocation3 + $0xf0] sm:$0xff] %vm554_vm3, %v519_v58 }
  0xd2   : > { %1645 = vrot.lane.b32.xlu0 %v2576_v56, %s2387_s28 }
  0xd3   : > { %v517_v8 = vpop.permute.xlu1 %516 }
  0xd4   : > { %584 = vst.msk [vmem:[#allocation3 + $0xe8] sm:$0xff] %vm554_vm3, %v517_v8  ;;  %v652_v10 = vpop.permute.xlu0 %651 }
  0xd5   : > { %1095 = vrot.lane.b32.xlu1 %v2711_v33, %s2384_s25  ;;  %748 = vst.msk [vmem:[#allocation3] sm:$0xff] %vm747_vm4, %v652_v10 }
  0xd6   : > { %1063 = vrot.lane.b32.xlu0 %v2572_v53, %s2384_s25 }
  0xd7   : > { %v521_v24 = vpop.permute.xlu1 %520 }
  0xd8   : > { %586 = vst.msk [vmem:[#allocation3 + $0xf8] sm:$0xff] %vm554_vm3, %v521_v24  ;;  %v656_v25 = vpop.permute.xlu0 %655 }
  0xd9   : > { %1870 = vrot.lane.b32.xlu1 %v1776_v16, %s2388_s29  ;;  %750 = vst.msk [vmem:[#allocation3 + $0x10] sm:$0xff] %vm747_vm4, %v656_v25 }
  0xda   : > { %1838 = vrot.lane.b32.xlu0 %v2751_v55, %s2388_s29 }
  0xdb   : > { %v654_v56 = vpop.permute.xlu1 %653 }
  0xdc   : > { %749 = vst.msk [vmem:[#allocation3 + $0x8] sm:$0xff] %vm747_vm4, %v654_v56  ;;  %v660_v32 = vpop.permute.xlu0 %659 }
  0xdd   : > { %1288 = vrot.lane.b32.xlu1 %v2798_v45, %s2385_s26  ;;  %752 = vst.msk [vmem:[#allocation3 + $0x20] sm:$0xff] %vm747_vm4, %v660_v32 }
  0xde   : > { %1482 = vrot.lane.b32.xlu0 %v2794_v40, %s2386_s27 }
  0xdf   : > { %v658_v7 = vpop.permute.xlu1 %657 }
  0xe0   : > { %751 = vst.msk [vmem:[#allocation3 + $0x18] sm:$0xff] %vm747_vm4, %v658_v7  ;;  %v664_v35 = vpop.permute.xlu0 %663 }
  0xe1   : > { %1256 = vrot.lane.b32.xlu1 %v2747_v54, %s2385_s26  ;;  %754 = vst.msk [vmem:[#allocation3 + $0x30] sm:$0xff] %vm747_vm4, %v664_v35 }
  0xe2   : > { %1450 = vrot.lane.b32.xlu0 %v2582_v59, %s2386_s27 }
  0xe3   : > { %v662_v55 = vpop.permute.xlu1 %661 }
  0xe4   : > { %753 = vst.msk [vmem:[#allocation3 + $0x28] sm:$0xff] %vm747_vm4, %v662_v55  ;;  %v668_v37 = vpop.permute.xlu0 %667 }
  0xe5   : > { %900 = vrot.lane.b32.xlu1 %v2689_v26, %s2383_s24  ;;  %756 = vst.msk [vmem:[#allocation3 + $0x40] sm:$0xff] %vm747_vm4, %v668_v37 }
  0xe6   : > { %868 = vrot.lane.b32.xlu0 %v2616_v2, %s2383_s24 }
  0xe7   : > { %v666_v40 = vpop.permute.xlu1 %665 }
  0xe8   : > { %755 = vst.msk [vmem:[#allocation3 + $0x38] sm:$0xff] %vm747_vm4, %v666_v40  ;;  %v672_v39 = vpop.permute.xlu0 %671 }
  0xe9   : > { %1675 = vrot.lane.b32.xlu1 %v2804_v9, %s2387_s28  ;;  %758 = vst.msk [vmem:[#allocation3 + $0x50] sm:$0xff] %vm747_vm4, %v672_v39 }
  0xea   : > { %1643 = vrot.lane.b32.xlu0 %v2620_v4, %s2387_s28 }
  0xeb   : > { %v670_v59 = vpop.permute.xlu1 %669 }
  0xec   : > { %757 = vst.msk [vmem:[#allocation3 + $0x48] sm:$0xff] %vm747_vm4, %v670_v59  ;;  %v676_v58 = vpop.permute.xlu0 %675  ;;  %v3023_v59 = vld [vmem:[#allocation2 + $0x81] sm:$0xff] }
  0xed   : > { %1093 = vrot.lane.b32.xlu1 %v2701_v30, %s2384_s25  ;;  %760 = vst.msk [vmem:[#allocation3 + $0x60] sm:$0xff] %vm747_vm4, %v676_v58 }
  0xee   : > { %1061 = vrot.lane.b32.xlu0 %v2557_v44, %s2384_s25 }
  0xef   : > { %v674_v8 = vpop.permute.xlu1 %673 }
  0xf0   : > { %759 = vst.msk [vmem:[#allocation3 + $0x58] sm:$0xff] %vm747_vm4, %v674_v8  ;;  %v680_v9 = vpop.permute.xlu0 %679 }
  0xf1   : > { %1868 = vrot.lane.b32.xlu1 %v2812_v20, %s2388_s29  ;;  %762 = vst.msk [vmem:[#allocation3 + $0x70] sm:$0xff] %vm747_vm4, %v680_v9 }
  0xf2   : > { %1836 = vrot.lane.b32.xlu0 %v2755_v57, %s2388_s29 }
  0xf3   : > { %v678_v4 = vpop.permute.xlu1 %677 }
  0xf4   : > { %761 = vst.msk [vmem:[#allocation3 + $0x68] sm:$0xff] %vm747_vm4, %v678_v4  ;;  %v684_v10 = vpop.permute.xlu0 %683 }
  0xf5   : > { %1286 = vrot.lane.b32.xlu1 %v2784_v36, %s2385_s26  ;;  %764 = vst.msk [vmem:[#allocation3 + $0x80] sm:$0xff] %vm747_vm4, %v684_v10 }
  0xf6   : > { %1480 = vrot.lane.b32.xlu0 %v2827_v41, %s2386_s27 }
  0xf7   : > { %v682_v44 = vpop.permute.xlu1 %681 }
  0xf8   : > { %763 = vst.msk [vmem:[#allocation3 + $0x78] sm:$0xff] %vm747_vm4, %v682_v44  ;;  %v688_v20 = vpop.permute.xlu0 %687 }
  0xf9   : > { %1254 = vrot.lane.b32.xlu1 %v2735_v49, %s2385_s26  ;;  %766 = vst.msk [vmem:[#allocation3 + $0x90] sm:$0xff] %vm747_vm4, %v688_v20 }
  0xfa   : > { %1448 = vrot.lane.b32.xlu0 %v2628_v6, %s2386_s27 }
  0xfb   : > { %v686_v57 = vpop.permute.xlu1 %685 }
  0xfc   : > { %765 = vst.msk [vmem:[#allocation3 + $0x88] sm:$0xff] %vm747_vm4, %v686_v57  ;;  %v692_v16 = vpop.permute.xlu0 %691 }
  0xfd   : > { %898 = vrot.lane.b32.xlu1 %v2681_v23, %s2383_s24  ;;  %768 = vst.msk [vmem:[#allocation3 + $0xa0] sm:$0xff] %vm747_vm4, %v692_v16  ;;  %v3064_v16 = vld [vmem:[#allocation2 + $0x79] sm:$0xff] }
  0xfe   : > { %866 = vrot.lane.b32.xlu0 %v2606_v1, %s2383_s24 }
  0xff   : > { %v690_v41 = vpop.permute.xlu1 %689 }
 0x100   : > { %767 = vst.msk [vmem:[#allocation3 + $0x98] sm:$0xff] %vm747_vm4, %v690_v41  ;;  %v696_v24 = vpop.permute.xlu0 %695 }
 0x101   : > { %1673 = vrot.lane.b32.xlu1 %v2840_v5, %s2387_s28  ;;  %770 = vst.msk [vmem:[#allocation3 + $0xb0] sm:$0xff] %vm747_vm4, %v696_v24 }
 0x102   : > { %1641 = vrot.lane.b32.xlu0 %v2567_v50, %s2387_s28 }
 0x103   : > { %v694_v6 = vpop.permute.xlu1 %693 }
 0x104   : > { %769 = vst.msk [vmem:[#allocation3 + $0xa8] sm:$0xff] %vm747_vm4, %v694_v6  ;;  %v700_v25 = vpop.permute.xlu0 %699 }
 0x105   : > { %1091 = vrot.lane.b32.xlu1 %v2705_v31, %s2384_s25  ;;  %772 = vst.msk [vmem:[#allocation3 + $0xc0] sm:$0xff] %vm747_vm4, %v700_v25 }
 0x106   : > { %1059 = vrot.lane.b32.xlu0 %v2560_v47, %s2384_s25 }
 0x107   : > { %v698_v56 = vpop.permute.xlu1 %697 }
 0x108   : > { %771 = vst.msk [vmem:[#allocation3 + $0xb8] sm:$0xff] %vm747_vm4, %v698_v56  ;;  %v704_v5 = vpop.permute.xlu0 %703 }
 0x109   : > { %1866 = vrot.lane.b32.xlu1 %v2853_v15, %s2388_s29  ;;  %774 = vst.msk [vmem:[#allocation3 + $0xd0] sm:$0xff] %vm747_vm4, %v704_v5 }
 0x10a   : > { %1834 = vrot.lane.b32.xlu0 %v2743_v52, %s2388_s29 }
 0x10b   : > { %v702_v50 = vpop.permute.xlu1 %701 }
 0x10c   : > { %773 = vst.msk [vmem:[#allocation3 + $0xc8] sm:$0xff] %vm747_vm4, %v702_v50  ;;  %v708_v32 = vpop.permute.xlu0 %707  ;;  %v1577_v50 = vld [vmem:[#allocation2 + $0x151] sm:$0xff] }
 0x10d   : > { %1284 = vrot.lane.b32.xlu1 %v2788_v38, %s2385_s26  ;;  %776 = vst.msk [vmem:[#allocation3 + $0xe0] sm:$0xff] %vm747_vm4, %v708_v32 }
 0x10e   : > { %1478 = vrot.lane.b32.xlu0 %v2663_v17, %s2386_s27 }
 0x10f   : > { %v706_v47 = vpop.permute.xlu1 %705 }
 0x110   : > { %775 = vst.msk [vmem:[#allocation3 + $0xd8] sm:$0xff] %vm747_vm4, %v706_v47  ;;  %v712_v15 = vpop.permute.xlu0 %711 }
 0x111   : > { %1252 = vrot.lane.b32.xlu1 %v2739_v51, %s2385_s26  ;;  %778 = vst.msk [vmem:[#allocation3 + $0xf0] sm:$0xff] %vm747_vm4, %v712_v15  ;;  %v3104_v15 = vld [vmem:[#allocation2 + $0x69] sm:$0xff] }
 0x112   : > { %1446 = vrot.lane.b32.xlu0 %v2618_v3, %s2386_s27 }
 0x113   : > { %v710_v52 = vpop.permute.xlu1 %709 }
 0x114   : > { %777 = vst.msk [vmem:[#allocation3 + $0xe8] sm:$0xff] %vm747_vm4, %v710_v52  ;;  %v907_v7 = vpop.permute.xlu0 %906 }
 0x115   : > { %896 = vrot.lane.b32.xlu1 %v2679_v22, %s2383_s24 }
 0x116   : > { %864 = vrot.lane.b32.xlu0 %v2604_v0, %s2383_s24 }
 0x117   : > { %v714_v17 = vpop.permute.xlu1 %713 }
 0x118   : > { %779 = vst.msk [vmem:[#allocation3 + $0xf8] sm:$0xff] %vm747_vm4, %v714_v17  ;;  %v1100_v3 = vpop.permute.xlu0 %1099 }
 0x119   : > { %1671 = vrot.lane.b32.xlu1 %v2711_v33, %s2387_s28  ;;  %972 = vst.msk [vmem:[#allocation3 + $0xf8] sm:$0xff] %vm940_vm5, %v907_v7  ;;  %v1754_v7 = vld [vmem:[#allocation2 + $0x92] sm:$0xff] }
 0x11a   : > { %1165 = vst.msk [vmem:[#allocation3 + $0xf8] sm:$0xff] %vm1133_vm6, %v1100_v3  ;;  %1639 = vrot.lane.b32.xlu0 %v2572_v53, %s2387_s28  ;;  %v3114_v3 = vld [vmem:[#allocation2 + $0x12a] sm:$0xff] }
 0x11b   : > { %v875_v35 = vpop.permute.xlu1 %874 }
 0x11c   : > { %956 = vst.msk [vmem:[#allocation3 + $0x78] sm:$0xff] %vm940_vm5, %v875_v35  ;;  %v1293_v55 = vpop.permute.xlu0 %1292 }
 0x11d   : > { %1089 = vrot.lane.b32.xlu1 %v2694_v28, %s2384_s25  ;;  %1358 = vst.msk [vmem:[#allocation3 + $0xf8] sm:$0xff] %vm1326_vm7, %v1293_v55 }
 0x11e   : > { %1057 = vrot.lane.b32.xlu0 %v2552_v42, %s2384_s25 }
 0x11f   : > { %v1068_v37 = vpop.permute.xlu1 %1067 }
 0x120   : > { %1149 = vst.msk [vmem:[#allocation3 + $0x78] sm:$0xff] %vm1133_vm6, %v1068_v37  ;;  %v1487_v53 = vpop.permute.xlu0 %1486 }
 0x121   : > { %1864 = vrot.lane.b32.xlu1 %v2798_v45, %s2388_s29  ;;  %1552 = vst.msk [vmem:[#allocation3 + $0xf8] sm:$0xff] %vm1520_vm8, %v1487_v53 }
 0x122   : > { %1832 = vrot.lane.b32.xlu0 %v2747_v54, %s2388_s29 }
 0x123   : > { %v1261_v33 = vpop.permute.xlu1 %1260 }
 0x124   : > { %1342 = vst.msk [vmem:[#allocation3 + $0x78] sm:$0xff] %vm1326_vm7, %v1261_v33  ;;  %v1455_v28 = vpop.permute.xlu0 %1454  ;;  %v3122_v33 = vld [vmem:[#allocation2 + $0x6a] sm:$0xff] }
 0x125   : > { %1282 = vrot.lane.b32.xlu1 %v2775_v27, %s2385_s26  ;;  %1536 = vst.msk [vmem:[#allocation3 + $0x78] sm:$0xff] %vm1520_vm8, %v1455_v28 }
 0x126   : > { %1476 = vrot.lane.b32.xlu0 %v2689_v26, %s2386_s27 }
 0x127   : > { %v905_v42 = vpop.permute.xlu1 %904 }
 0x128   : > { %971 = vst.msk [vmem:[#allocation3 + $0xf0] sm:$0xff] %vm940_vm5, %v905_v42  ;;  %v873_v45 = vpop.permute.xlu0 %872 }
 0x129   : > { %1250 = vrot.lane.b32.xlu1 %v2728_v46, %s2385_s26  ;;  %955 = vst.msk [vmem:[#allocation3 + $0x70] sm:$0xff] %vm940_vm5, %v873_v45  ;;  %v1563_v46 = vld [vmem:[#allocation2 + $0xa9] sm:$0xff] }
 0x12a   : > { %1444 = vrot.lane.b32.xlu0 %v2616_v2, %s2386_s27 }
 0x12b   : > { %v1680_v54 = vpop.permute.xlu1 %1679 }
 0x12c   : > { %1745 = vst.msk [vmem:[#allocation3 + $0xf8] sm:$0xff] %vm1713_vm9, %v1680_v54  ;;  %v1648_v40 = vpop.permute.xlu0 %1647  ;;  %v1576_v54 = vld [vmem:[#allocation2 + $0x141] sm:$0xff] }
 0x12d   : > { %894 = vrot.lane.b32.xlu1 %v2669_v19, %s2383_s24  ;;  %1729 = vst.msk [vmem:[#allocation3 + $0x78] sm:$0xff] %vm1713_vm9, %v1648_v40 }
 0x12e   : > { %862 = vrot.lane.b32.xlu0 %v2602_v63, %s2383_s24 }
 0x12f   : > { %v1098_v26 = vpop.permute.xlu1 %1097 }
 0x130   : > { %1164 = vst.msk [vmem:[#allocation3 + $0xf0] sm:$0xff] %vm1133_vm6, %v1098_v26  ;;  %v1066_v2 = vpop.permute.xlu0 %1065  ;;  %v3142_v26 = vld [vmem:[#allocation2 + $0x121] sm:$0xff] }
 0x131   : > { %1669 = vrot.lane.b32.xlu1 %v2701_v30, %s2387_s28  ;;  %1148 = vst.msk [vmem:[#allocation3 + $0x70] sm:$0xff] %vm1133_vm6, %v1066_v2 }
 0x132   : > { %1637 = vrot.lane.b32.xlu0 %v1563_v46, %s2387_s28  ;;  %v1769_v46 = vld [vmem:[#allocation2 + $0x142] sm:$0xff] }
 0x133   : > { %v1873_v39 = vpop.permute.xlu1 %1872 }
 0x134   : > { %1938 = vst.msk [vmem:[#allocation3 + $0xf8] sm:$0xff] %vm1906_vm10, %v1873_v39  ;;  %v1841_v58 = vpop.permute.xlu0 %1840  ;;  %v1753_v39 = vld [vmem:[#allocation2 + $0x82] sm:$0xff] }
 0x135   : > { %1087 = vrot.lane.b32.xlu1 %v2697_v29, %s2384_s25  ;;  %1922 = vst.msk [vmem:[#allocation3 + $0x78] sm:$0xff] %vm1906_vm10, %v1841_v58  ;;  %v3157_v58 = vld [vmem:[#allocation2 + $0x122] sm:$0xff] }
 0x136   : > { %1055 = vrot.lane.b32.xlu0 %v3023_v59, %s2384_s25 }
 0x137   : > { %v1291_v8 = vpop.permute.xlu1 %1290 }
 0x138   : > { %1357 = vst.msk [vmem:[#allocation3 + $0xf0] sm:$0xff] %vm1326_vm7, %v1291_v8  ;;  %v1485_v30 = vpop.permute.xlu0 %1484 }
 0x139   : > { %1862 = vrot.lane.b32.xlu1 %v2784_v36, %s2388_s29  ;;  %1551 = vst.msk [vmem:[#allocation3 + $0xf0] sm:$0xff] %vm1520_vm8, %v1485_v30 }
 0x13a   : > { %1830 = vrot.lane.b32.xlu0 %v2735_v49, %s2388_s29 }
 0x13b   : > { %v1259_v9 = vpop.permute.xlu1 %1258  ;;  %v1971_v4 = vld [vmem:[#allocation3 + $0xf8] sm:$0xff] }
 0x13c   : > { %1341 = vst.msk [vmem:[#allocation3 + $0x70] sm:$0xff] %vm1326_vm7, %v1259_v9  ;;  %2321 = vmatprep.subr.msk.mxu0 %vm1972_vm11, %v1971_v4  ;;  %v1453_v29 = vpop.permute.xlu0 %1452  ;;  %v1955_v10 = vld [vmem:[#allocation3 + $0x78] sm:$0xff] }
 0x13d   : > { %1280 = vrot.lane.b32.xlu1 %v2778_v34, %s2385_s26  ;;  %1535 = vst.msk [vmem:[#allocation3 + $0x70] sm:$0xff] %vm1520_vm8, %v1453_v29  ;;  %2322 = vmatpush3.xpose.msk.msra.mxu0 %vm1972_vm11, %v1955_v10  ;;  %v3165_v29 = vld [vmem:[#allocation2 + $0x62] sm:$0xff] }
 0x13e   : > { %1474 = vrot.lane.b32.xlu0 %v2681_v23, %s2386_s27 }
 0x13f   : > { %v903_v36 = vpop.permute.xlu1 %902 }
 0x140   : > { %970 = vst.msk [vmem:[#allocation3 + $0xe8] sm:$0xff] %vm940_vm5, %v903_v36  ;;  %v871_v49 = vpop.permute.xlu0 %870  ;;  %v1366_v36 = vld [vmem:[#allocation2 + $0x78] sm:$0xff] }
 0x141   : > { %1248 = vrot.lane.b32.xlu1 %v2731_v48, %s2385_s26  ;;  %954 = vst.msk [vmem:[#allocation3 + $0x68] sm:$0xff] %vm940_vm5, %v871_v49  ;;  %v1562_v48 = vld [vmem:[#allocation2 + $0x99] sm:$0xff] }
 0x142   : > { %1442 = vrot.lane.b32.xlu0 %v2606_v1, %s2386_s27  ;;  %v3059_v1 = vld [vmem:[#allocation2 + $0x139] sm:$0xff] }
 0x143   : > { %v1678_v44 = vpop.permute.xlu1 %1677 }
 0x144   : > { %1744 = vst.msk [vmem:[#allocation3 + $0xf0] sm:$0xff] %vm1713_vm9, %v1678_v44  ;;  %v1646_v34 = vpop.permute.xlu0 %1645 }
 0x145   : > { %892 = vrot.lane.b32.xlu1 %v2667_v18, %s2383_s24  ;;  %1728 = vst.msk [vmem:[#allocation3 + $0x70] sm:$0xff] %vm1713_vm9, %v1646_v34  ;;  %v3177_v34 = vld [vmem:[#allocation2 + $0x50] sm:$0xff] }
 0x146   : > { %860 = vrot.lane.b32.xlu0 %v2592_v62, %s2383_s24 }
 0x147   : > { %v1096_v23 = vpop.permute.xlu1 %1095 }
 0x148   : > { %1163 = vst.msk [vmem:[#allocation3 + $0xe8] sm:$0xff] %vm1133_vm6, %v1096_v23  ;;  %v1064_v20 = vpop.permute.xlu0 %1063 }
 0x149   : > { %1667 = vrot.lane.b32.xlu1 %v2705_v31, %s2387_s28  ;;  %1147 = vst.msk [vmem:[#allocation3 + $0x68] sm:$0xff] %vm1133_vm6, %v1064_v20  ;;  %v3187_v20 = vld [vmem:[#allocation2 + $0x111] sm:$0xff] }
 0x14a   : > { %1635 = vrot.lane.b32.xlu0 %v1562_v48, %s2387_s28 }
 0x14b   : > { %v1871_v57 = vpop.permute.xlu1 %1870 }
 0x14c   : > { %1937 = vst.msk [vmem:[#allocation3 + $0xf0] sm:$0xff] %vm1906_vm10, %v1871_v57  ;;  %v1839_v62 = vpop.permute.xlu0 %1838 }
 0x14d   : > { %1085 = vrot.lane.b32.xlu1 %v3059_v1, %s2384_s25  ;;  %1921 = vst.msk [vmem:[#allocation3 + $0x70] sm:$0xff] %vm1906_vm10, %v1839_v62 }
 0x14e   : > { %1053 = vrot.lane.b32.xlu0 %v3064_v16, %s2384_s25 }
 0x14f   : > { %v1289_v41 = vpop.permute.xlu1 %1288 }
 0x150   : > { %1356 = vst.msk [vmem:[#allocation3 + $0xe8] sm:$0xff] %vm1326_vm7, %v1289_v41  ;;  %v1483_v31 = vpop.permute.xlu0 %1482  ;;  %v1768_v41 = vld [vmem:[#allocation2 + $0x13a] sm:$0xff] }
 0x151   : > { %1860 = vrot.lane.b32.xlu1 %v2788_v38, %s2388_s29  ;;  %1550 = vst.msk [vmem:[#allocation3 + $0xe8] sm:$0xff] %vm1520_vm8, %v1483_v31  ;;  %v1752_v31 = vld [vmem:[#allocation2 + $0x7a] sm:$0xff] }
 0x152   : > { %1828 = vrot.lane.b32.xlu0 %v2739_v51, %s2388_s29 }
 0x153   : > { %v1257_v24 = vpop.permute.xlu1 %1256  ;;  %v1970_v6 = vld [vmem:[#allocation3 + $0xf0] sm:$0xff] }
 0x154   : > { %1340 = vst.msk [vmem:[#allocation3 + $0x68] sm:$0xff] %vm1326_vm7, %v1257_v24  ;;  %2323 = vmatprep.subr.msk.mxu0 %vm1972_vm11, %v1970_v6  ;;  %v1451_v25 = vpop.permute.xlu0 %1450  ;;  %v1954_v56 = vld [vmem:[#allocation3 + $0x70] sm:$0xff]  ;;  %v3202_v24 = vld [vmem:[#allocation2 + $0x112] sm:$0xff] }
 0x155   : > { %1278 = vrot.lane.b32.xlu1 %v2769_v21, %s2385_s26  ;;  %1534 = vst.msk [vmem:[#allocation3 + $0x68] sm:$0xff] %vm1520_vm8, %v1451_v25  ;;  %2324 = vmatpush3.xpose.msk.msra.mxu0 %vm1972_vm11, %v1954_v56 }
 0x156   : > { %1472 = vrot.lane.b32.xlu0 %v2679_v22, %s2386_s27 }
 0x157   : > { %v901_v38 = vpop.permute.xlu1 %900 }
 0x158   : > { %969 = vst.msk [vmem:[#allocation3 + $0xe0] sm:$0xff] %vm940_vm5, %v901_v38  ;;  %v869_v51 = vpop.permute.xlu0 %868 }
 0x159   : > { %1246 = vrot.lane.b32.xlu1 %v2723_v43, %s2385_s26  ;;  %953 = vst.msk [vmem:[#allocation3 + $0x60] sm:$0xff] %vm940_vm5, %v869_v51  ;;  %v1561_v43 = vld [vmem:[#allocation2 + $0x91] sm:$0xff] }
 0x15a   : > { %1440 = vrot.lane.b32.xlu0 %v2604_v0, %s2386_s27  ;;  %v3099_v0 = vld [vmem:[#allocation2 + $0x129] sm:$0xff]  ;;  %v3210_v51 = vld [vmem:[#allocation2 + $0x52] sm:$0xff] }
 0x15b   : > { %v1676_v5 = vpop.permute.xlu1 %1675 }
 0x15c   : > { %1743 = vst.msk [vmem:[#allocation3 + $0xe8] sm:$0xff] %vm1713_vm9, %v1676_v5  ;;  %v1644_v21 = vpop.permute.xlu0 %1643 }
 0x15d   : > { %890 = vrot.lane.b32.xlu1 %v2654_v14, %s2383_s24  ;;  %1727 = vst.msk [vmem:[#allocation3 + $0x68] sm:$0xff] %vm1713_vm9, %v1644_v21  ;;  %v1365_v21 = vld [vmem:[#allocation2 + $0x68] sm:$0xff] }
 0x15e   : > { %858 = vrot.lane.b32.xlu0 %v2590_v61, %s2383_s24 }
 0x15f   : > { %v1094_v22 = vpop.permute.xlu1 %1093 }
 0x160   : > { %1162 = vst.msk [vmem:[#allocation3 + $0xe0] sm:$0xff] %vm1133_vm6, %v1094_v22  ;;  %v1062_v32 = vpop.permute.xlu0 %1061 }
 0x161   : > { %1665 = vrot.lane.b32.xlu1 %v1577_v50, %s2387_s28  ;;  %1146 = vst.msk [vmem:[#allocation3 + $0x60] sm:$0xff] %vm1133_vm6, %v1062_v32 }
 0x162   : > { %1633 = vrot.lane.b32.xlu0 %v1561_v43, %s2387_s28  ;;  %v3222_v43 = vld [vmem:[#allocation2 + $0x48] sm:$0xff] }
 0x163   : > { %v1869_v47 = vpop.permute.xlu1 %1868 }
 0x164   : > { %1936 = vst.msk [vmem:[#allocation3 + $0xe8] sm:$0xff] %vm1906_vm10, %v1869_v47  ;;  %v1837_v61 = vpop.permute.xlu0 %1836 }
 0x165   : > { %1083 = vrot.lane.b32.xlu1 %v3099_v0, %s2384_s25  ;;  %1920 = vst.msk [vmem:[#allocation3 + $0x68] sm:$0xff] %vm1906_vm10, %v1837_v61  ;;  %v3232_v61 = vld [vmem:[#allocation2 + $0x109] sm:$0xff] }
 0x166   : > { %1051 = vrot.lane.b32.xlu0 %v3104_v15, %s2384_s25 }
 0x167   : > { %v1287_v52 = vpop.permute.xlu1 %1286 }
 0x168   : > { %1355 = vst.msk [vmem:[#allocation3 + $0xe0] sm:$0xff] %vm1326_vm7, %v1287_v52  ;;  %v1481_v17 = vpop.permute.xlu0 %1480 }
 0x169   : > { %1858 = vrot.lane.b32.xlu1 %v2775_v27, %s2388_s29  ;;  %1549 = vst.msk [vmem:[#allocation3 + $0xe0] sm:$0xff] %vm1520_vm8, %v1481_v17  ;;  %v3248_v17 = vld [vmem:[#allocation2 + $0x10a] sm:$0xff] }
 0x16a   : > { %1826 = vrot.lane.b32.xlu0 %v1754_v7, %s2388_s29 }
 0x16b   : > { %v1255_v35 = vpop.permute.xlu1 %1254  ;;  %v1969_v55 = vld [vmem:[#allocation3 + $0xe8] sm:$0xff] }
 0x16c   : > { %1339 = vst.msk [vmem:[#allocation3 + $0x60] sm:$0xff] %vm1326_vm7, %v1255_v35  ;;  %2325 = vmatprep.subr.msk.mxu0 %vm1972_vm11, %v1969_v55  ;;  %v1449_v37 = vpop.permute.xlu0 %1448  ;;  %v1953_v53 = vld [vmem:[#allocation3 + $0x68] sm:$0xff] }
 0x16d   : > { %1276 = vrot.lane.b32.xlu1 %v3114_v3, %s2385_s26  ;;  %1533 = vst.msk [vmem:[#allocation3 + $0x60] sm:$0xff] %vm1520_vm8, %v1449_v37  ;;  %2326 = vmatpush3.xpose.msk.msra.mxu0 %vm1972_vm11, %v1953_v53  ;;  %v1380_v37 = vld [vmem:[#allocation2 + $0x120] sm:$0xff] }
 0x16e   : > { %1470 = vrot.lane.b32.xlu0 %v2669_v19, %s2386_s27 }
 0x16f   : > { %v899_v27 = vpop.permute.xlu1 %898 }
 0x170   : > { %968 = vst.msk [vmem:[#allocation3 + $0xd8] sm:$0xff] %vm940_vm5, %v899_v27  ;;  %v867_v28 = vpop.permute.xlu0 %866  ;;  %v3257_v27 = vld [vmem:[#allocation2 + $0x4a] sm:$0xff] }
 0x171   : > { %1244 = vrot.lane.b32.xlu1 %v3122_v33, %s2385_s26  ;;  %952 = vst.msk [vmem:[#allocation3 + $0x58] sm:$0xff] %vm940_vm5, %v867_v28 }
 0x172   : > { %1438 = vrot.lane.b32.xlu0 %v2602_v63, %s2386_s27 }
 0x173   : > { %v1674_v42 = vpop.permute.xlu1 %1673 }
 0x174   : > { %1742 = vst.msk [vmem:[#allocation3 + $0xe0] sm:$0xff] %vm1713_vm9, %v1674_v42  ;;  %v1642_v45 = vpop.permute.xlu0 %1641 }
 0x175   : > { %888 = vrot.lane.b32.xlu1 %v2652_v13, %s2383_s24  ;;  %1726 = vst.msk [vmem:[#allocation3 + $0x60] sm:$0xff] %vm1713_vm9, %v1642_v45  ;;  %v3148_v13 = vld [vmem:[#allocation2 + $0x61] sm:$0xff]  ;;  %v3265_v45 = vld [vmem:[#allocation2 + $0xf8] sm:$0xff] }
 0x176   : > { %856 = vrot.lane.b32.xlu0 %v2588_v60, %s2383_s24 }
 0x177   : > { %v1092_v19 = vpop.permute.xlu1 %1091 }
 0x178   : > { %1161 = vst.msk [vmem:[#allocation3 + $0xd8] sm:$0xff] %vm1133_vm6, %v1092_v19  ;;  %v1060_v40 = vpop.permute.xlu0 %1059  ;;  %v3270_v19 = vld [vmem:[#allocation2 + $0x38] sm:$0xff] }
 0x179   : > { %1663 = vrot.lane.b32.xlu1 %v1576_v54, %s2387_s28  ;;  %1145 = vst.msk [vmem:[#allocation3 + $0x58] sm:$0xff] %vm1133_vm6, %v1060_v40 }
 0x17a   : > { %1631 = vrot.lane.b32.xlu0 %v3023_v59, %s2387_s28 }
 0x17b   : > { %v1867_v63 = vpop.permute.xlu1 %1866 }
 0x17c   : > { %1935 = vst.msk [vmem:[#allocation3 + $0xe0] sm:$0xff] %vm1906_vm10, %v1867_v63  ;;  %v1835_v60 = vpop.permute.xlu0 %1834 }
 0x17d   : > { %1081 = vrot.lane.b32.xlu1 %v3142_v26, %s2384_s25  ;;  %1919 = vst.msk [vmem:[#allocation3 + $0x60] sm:$0xff] %vm1906_vm10, %v1835_v60 }
 0x17e   : > { %1049 = vrot.lane.b32.xlu0 %v3148_v13, %s2384_s25 }
 0x17f   : > { %v1285_v2 = vpop.permute.xlu1 %1284 }
 0x180   : > { %1354 = vst.msk [vmem:[#allocation3 + $0xd8] sm:$0xff] %vm1326_vm7, %v1285_v2  ;;  %v1479_v59 = vpop.permute.xlu0 %1478 }
 0x181   : > { %1856 = vrot.lane.b32.xlu1 %v1769_v46, %s2388_s29  ;;  %1548 = vst.msk [vmem:[#allocation3 + $0xd8] sm:$0xff] %vm1520_vm8, %v1479_v59  ;;  %v3280_v46 = vld [vmem:[#allocation2 + $0xf9] sm:$0xff] }
 0x182   : > { %1824 = vrot.lane.b32.xlu0 %v1753_v39, %s2388_s29  ;;  %v3286_v39 = vld [vmem:[#allocation2 + $0x39] sm:$0xff] }
 0x183   : > { %v1253_v8 = vpop.permute.xlu1 %1252  ;;  %v1968_v30 = vld [vmem:[#allocation3 + $0xe0] sm:$0xff] }
 0x184   : > { %1338 = vst.msk [vmem:[#allocation3 + $0x58] sm:$0xff] %vm1326_vm7, %v1253_v8  ;;  %2327 = vmatprep.subr.msk.mxu0 %vm1972_vm11, %v1968_v30  ;;  %v1447_v9 = vpop.permute.xlu0 %1446  ;;  %v1952_v4 = vld [vmem:[#allocation3 + $0x60] sm:$0xff]  ;;  %v3296_v8 = vld [vmem:[#allocation2 + $0xfa] sm:$0xff] }
 0x185   : > { %1274 = vrot.lane.b32.xlu1 %v3157_v58, %s2385_s26  ;;  %1532 = vst.msk [vmem:[#allocation3 + $0x58] sm:$0xff] %vm1520_vm8, %v1447_v9  ;;  %2328 = vmatpush3.xpose.msk.msra.mxu0 %vm1972_vm11, %v1952_v4  ;;  %v1379_v4 = vld [vmem:[#allocation2 + $0x110] sm:$0xff] }
 0x186   : > { %1468 = vrot.lane.b32.xlu0 %v2667_v18, %s2386_s27 }
 0x187   : > { %v897_v10 = vpop.permute.xlu1 %896 }
 0x188   : > { %967 = vst.msk [vmem:[#allocation3 + $0xd0] sm:$0xff] %vm940_vm5, %v897_v10  ;;  %v865_v49 = vpop.permute.xlu0 %864 }
 0x189   : > { %1242 = vrot.lane.b32.xlu1 %v3165_v29, %s2385_s26  ;;  %951 = vst.msk [vmem:[#allocation3 + $0x50] sm:$0xff] %vm940_vm5, %v865_v49 }
 0x18a   : > { %1436 = vrot.lane.b32.xlu0 %v1366_v36, %s2386_s27  ;;  %v3305_v36 = vld [vmem:[#allocation2 + $0x3a] sm:$0xff] }
 0x18b   : > { %v1672_v44 = vpop.permute.xlu1 %1671 }
 0x18c   : > { %1741 = vst.msk [vmem:[#allocation3 + $0xd8] sm:$0xff] %vm1713_vm9, %v1672_v44  ;;  %v1640_v18 = vpop.permute.xlu0 %1639  ;;  %v3313_v44 = vld [vmem:[#allocation2 + $0xf0] sm:$0xff] }
 0x18d   : > { %886 = vrot.lane.b32.xlu1 %v2643_v12, %s2383_s24  ;;  %1725 = vst.msk [vmem:[#allocation3 + $0x58] sm:$0xff] %vm1713_vm9, %v1640_v18  ;;  %v3193_v12 = vld [vmem:[#allocation2 + $0x51] sm:$0xff] }
 0x18e   : > { %854 = vrot.lane.b32.xlu0 %v3177_v34, %s2383_s24 }
 0x18f   : > { %v1090_v23 = vpop.permute.xlu1 %1089 }
 0x190   : > { %1160 = vst.msk [vmem:[#allocation3 + $0xd0] sm:$0xff] %vm1133_vm6, %v1090_v23  ;;  %v1058_v48 = vpop.permute.xlu0 %1057  ;;  %v3319_v23 = vld [vmem:[#allocation2 + $0x30] sm:$0xff] }
 0x191   : > { %1661 = vrot.lane.b32.xlu1 %v3059_v1, %s2387_s28  ;;  %1144 = vst.msk [vmem:[#allocation3 + $0x50] sm:$0xff] %vm1133_vm6, %v1058_v48 }
 0x192   : > { %1629 = vrot.lane.b32.xlu0 %v3064_v16, %s2387_s28 }
 0x193   : > { %v1865_v57 = vpop.permute.xlu1 %1864 }
 0x194   : > { %1934 = vst.msk [vmem:[#allocation3 + $0xd8] sm:$0xff] %vm1906_vm10, %v1865_v57  ;;  %v1833_v62 = vpop.permute.xlu0 %1832 }
 0x195   : > { %1079 = vrot.lane.b32.xlu1 %v3187_v20, %s2384_s25  ;;  %1918 = vst.msk [vmem:[#allocation3 + $0x58] sm:$0xff] %vm1906_vm10, %v1833_v62  ;;  %v3329_v62 = vld [vmem:[#allocation2 + $0xf1] sm:$0xff] }
 0x196   : > { %1047 = vrot.lane.b32.xlu0 %v3193_v12, %s2384_s25 }
 0x197   : > { %v1283_v1 = vpop.permute.xlu1 %1282 }
 0x198   : > { %1353 = vst.msk [vmem:[#allocation3 + $0xd0] sm:$0xff] %vm1326_vm7, %v1283_v1  ;;  %v1477_v16 = vpop.permute.xlu0 %1476  ;;  %v3335_v1 = vld [vmem:[#allocation2 + $0x31] sm:$0xff] }
 0x199   : > { %1854 = vrot.lane.b32.xlu1 %v1768_v41, %s2388_s29  ;;  %1547 = vst.msk [vmem:[#allocation3 + $0xd0] sm:$0xff] %vm1520_vm8, %v1477_v16  ;;  %v3345_v16 = vld [vmem:[#allocation2 + $0xf2] sm:$0xff] }
 0x19a   : > { %1822 = vrot.lane.b32.xlu0 %v1752_v31, %s2388_s29 }
 0x19b   : > { %v1251_v6 = vpop.permute.xlu1 %1250  ;;  %v1967_v25 = vld [vmem:[#allocation3 + $0xd8] sm:$0xff] }
 0x19c   : > { %1337 = vst.msk [vmem:[#allocation3 + $0x50] sm:$0xff] %vm1326_vm7, %v1251_v6  ;;  %2329 = vmatprep.subr.msk.mxu0 %vm1972_vm11, %v1967_v25  ;;  %v1445_v56 = vpop.permute.xlu0 %1444  ;;  %v1951_v38 = vld [vmem:[#allocation3 + $0x58] sm:$0xff] }
 0x19d   : > { %1272 = vrot.lane.b32.xlu1 %v3202_v24, %s2385_s26  ;;  %1531 = vst.msk [vmem:[#allocation3 + $0x50] sm:$0xff] %vm1520_vm8, %v1445_v56  ;;  %2330 = vmatpush3.xpose.msk.msra.mxu0 %vm1972_vm11, %v1951_v38  ;;  %v1378_v56 = vld [vmem:[#allocation2 + $0x108] sm:$0xff] }
 0x19e   : > { %1466 = vrot.lane.b32.xlu0 %v2654_v14, %s2386_s27 }
 0x19f   : > { %v895_v5 = vpop.permute.xlu1 %894 }
 0x1a0   : > { %966 = vst.msk [vmem:[#allocation3 + $0xc8] sm:$0xff] %vm940_vm5, %v895_v5  ;;  %v863_v50 = vpop.permute.xlu0 %862  ;;  %v3354_v5 = vld [vmem:[#allocation2 + $0x32] sm:$0xff] }
 0x1a1   : > { %1240 = vrot.lane.b32.xlu1 %v3210_v51, %s2385_s26  ;;  %950 = vst.msk [vmem:[#allocation3 + $0x48] sm:$0xff] %vm940_vm5, %v863_v50  ;;  %v797_v50 = vld [vmem:[#allocation2 + $0xe0] sm:$0xff] }
 0x1a2   : > { %1434 = vrot.lane.b32.xlu0 %v1365_v21, %s2386_s27 }
 0x1a3   : > { %v1670_v22 = vpop.permute.xlu1 %1669 }
 0x1a4   : > { %1740 = vst.msk [vmem:[#allocation3 + $0xd0] sm:$0xff] %vm1713_vm9, %v1670_v22  ;;  %v1638_v14 = vpop.permute.xlu0 %1637 }
 0x1a5   : > { %884 = vrot.lane.b32.xlu1 %v2641_v11, %s2383_s24  ;;  %1724 = vst.msk [vmem:[#allocation3 + $0x50] sm:$0xff] %vm1713_vm9, %v1638_v14  ;;  %v3238_v11 = vld [vmem:[#allocation2 + $0x49] sm:$0xff]  ;;  %v781_v14 = vld [vmem:[#allocation2 + $0x20] sm:$0xff] }
 0x1a6   : > { %852 = vrot.lane.b32.xlu0 %v3222_v43, %s2383_s24 }
 0x1a7   : > { %v1088_v32 = vpop.permute.xlu1 %1087 }
 0x1a8   : > { %1159 = vst.msk [vmem:[#allocation3 + $0xc8] sm:$0xff] %vm1133_vm6, %v1088_v32  ;;  %v1056_v47 = vpop.permute.xlu0 %1055 }
 0x1a9   : > { %1659 = vrot.lane.b32.xlu1 %v3099_v0, %s2387_s28  ;;  %1143 = vst.msk [vmem:[#allocation3 + $0x48] sm:$0xff] %vm1133_vm6, %v1056_v47 }
 0x1aa   : > { %1627 = vrot.lane.b32.xlu0 %v3104_v15, %s2387_s28 }
 0x1ab   : > { %v1863_v52 = vpop.permute.xlu1 %1862 }
 0x1ac   : > { %1933 = vst.msk [vmem:[#allocation3 + $0xd0] sm:$0xff] %vm1906_vm10, %v1863_v52  ;;  %v1831_v7 = vpop.permute.xlu0 %1830 }
 0x1ad   : > { %1077 = vrot.lane.b32.xlu1 %v3232_v61, %s2384_s25  ;;  %1917 = vst.msk [vmem:[#allocation3 + $0x50] sm:$0xff] %vm1906_vm10, %v1831_v7  ;;  %v990_v7 = vld [vmem:[#allocation2 + $0xe1] sm:$0xff] }
 0x1ae   : > { %1045 = vrot.lane.b32.xlu0 %v3238_v11, %s2384_s25 }
 0x1af   : > { %v1281_v0 = vpop.permute.xlu1 %1280 }
 0x1b0   : > { %1352 = vst.msk [vmem:[#allocation3 + $0xc8] sm:$0xff] %vm1326_vm7, %v1281_v0  ;;  %v1475_v15 = vpop.permute.xlu0 %1474  ;;  %v974_v0 = vld [vmem:[#allocation2 + $0x21] sm:$0xff] }
 0x1b1   : > { %1852 = vrot.lane.b32.xlu1 %v3114_v3, %s2388_s29  ;;  %1546 = vst.msk [vmem:[#allocation3 + $0xc8] sm:$0xff] %vm1520_vm8, %v1475_v15 }
 0x1b2   : > { %1820 = vrot.lane.b32.xlu0 %v3122_v33, %s2388_s29  ;;  %v1364_v33 = vld [vmem:[#allocation2 + $0x60] sm:$0xff] }
 0x1b3   : > { %v1249_v35 = vpop.permute.xlu1 %1248  ;;  %v1966_v55 = vld [vmem:[#allocation3 + $0xd0] sm:$0xff] }
 0x1b4   : > { %1336 = vst.msk [vmem:[#allocation3 + $0x48] sm:$0xff] %vm1326_vm7, %v1249_v35  ;;  %2331 = vmatprep.subr.msk.mxu0 %vm1972_vm11, %v1966_v55  ;;  %v1443_v53 = vpop.permute.xlu0 %1442  ;;  %v1950_v3 = vld [vmem:[#allocation3 + $0x50] sm:$0xff] }
 0x1b5   : > { %1270 = vrot.lane.b32.xlu1 %v3248_v17, %s2385_s26  ;;  %1530 = vst.msk [vmem:[#allocation3 + $0x48] sm:$0xff] %vm1520_vm8, %v1443_v53  ;;  %2332 = vmatpush3.xpose.msk.msra.mxu0 %vm1972_vm11, %v1950_v3  ;;  %v1183_v55 = vld [vmem:[#allocation2 + $0xe2] sm:$0xff] }
 0x1b6   : > { %1464 = vrot.lane.b32.xlu0 %v1380_v37, %s2386_s27 }
 0x1b7   : > { %v893_v28 = vpop.permute.xlu1 %892 }
 0x1b8   : > { %965 = vst.msk [vmem:[#allocation3 + $0xc0] sm:$0xff] %vm940_vm5, %v893_v28  ;;  %v861_v42 = vpop.permute.xlu0 %860  ;;  %v1167_v28 = vld [vmem:[#allocation2 + $0x22] sm:$0xff] }
 0x1b9   : > { %1238 = vrot.lane.b32.xlu1 %v3257_v27, %s2385_s26  ;;  %949 = vst.msk [vmem:[#allocation3 + $0x40] sm:$0xff] %vm940_vm5, %v861_v42 }
 0x1ba   : > { %1432 = vrot.lane.b32.xlu0 %v1364_v33, %s2386_s27  ;;  %v796_v33 = vld [vmem:[#allocation2 + $0xd8] sm:$0xff] }
 0x1bb   : > { %v1668_v54 = vpop.permute.xlu1 %1667 }
 0x1bc   : > { %1739 = vst.msk [vmem:[#allocation3 + $0xc8] sm:$0xff] %vm1713_vm9, %v1668_v54  ;;  %v1636_v40 = vpop.permute.xlu0 %1635  ;;  %v780_v54 = vld [vmem:[#allocation2 + $0x18] sm:$0xff] }
 0x1bd   : > { %882 = vrot.lane.b32.xlu1 %v3265_v45, %s2383_s24  ;;  %1723 = vst.msk [vmem:[#allocation3 + $0x48] sm:$0xff] %vm1713_vm9, %v1636_v40 }
 0x1be   : > { %850 = vrot.lane.b32.xlu0 %v3270_v19, %s2383_s24 }
 0x1bf   : > { %v1086_v63 = vpop.permute.xlu1 %1085 }
 0x1c0   : > { %1158 = vst.msk [vmem:[#allocation3 + $0xc0] sm:$0xff] %vm1133_vm6, %v1086_v63  ;;  %v1054_v60 = vpop.permute.xlu0 %1053 }
 0x1c1   : > { %1657 = vrot.lane.b32.xlu1 %v3142_v26, %s2387_s28  ;;  %1142 = vst.msk [vmem:[#allocation3 + $0x40] sm:$0xff] %vm1133_vm6, %v1054_v60  ;;  %v989_v60 = vld [vmem:[#allocation2 + $0xd9] sm:$0xff] }
 0x1c2   : > { %1625 = vrot.lane.b32.xlu0 %v3148_v13, %s2387_s28 }
 0x1c3   : > { %v1861_v2 = vpop.permute.xlu1 %1860 }
 0x1c4   : > { %1932 = vst.msk [vmem:[#allocation3 + $0xc8] sm:$0xff] %vm1906_vm10, %v1861_v2  ;;  %v1829_v59 = vpop.permute.xlu0 %1828  ;;  %v973_v2 = vld [vmem:[#allocation2 + $0x19] sm:$0xff] }
 0x1c5   : > { %1075 = vrot.lane.b32.xlu1 %v3280_v46, %s2384_s25  ;;  %1916 = vst.msk [vmem:[#allocation3 + $0x48] sm:$0xff] %vm1906_vm10, %v1829_v59 }
 0x1c6   : > { %1043 = vrot.lane.b32.xlu0 %v3286_v39, %s2384_s25 }
 0x1c7   : > { %v1279_v26 = vpop.permute.xlu1 %1278 }
 0x1c8   : > { %1351 = vst.msk [vmem:[#allocation3 + $0xc0] sm:$0xff] %vm1326_vm7, %v1279_v26  ;;  %v1473_v13 = vpop.permute.xlu0 %1472 }
 0x1c9   : > { %1850 = vrot.lane.b32.xlu1 %v3157_v58, %s2388_s29  ;;  %1545 = vst.msk [vmem:[#allocation3 + $0xc0] sm:$0xff] %vm1520_vm8, %v1473_v13  ;;  %v1182_v13 = vld [vmem:[#allocation2 + $0xda] sm:$0xff] }
 0x1ca   : > { %1818 = vrot.lane.b32.xlu0 %v3165_v29, %s2388_s29 }
 0x1cb   : > { %v1247_v30 = vpop.permute.xlu1 %1246  ;;  %v1965_v9 = vld [vmem:[#allocation3 + $0xc8] sm:$0xff] }
 0x1cc   : > { %1335 = vst.msk [vmem:[#allocation3 + $0x40] sm:$0xff] %vm1326_vm7, %v1247_v30  ;;  %2333 = vmatprep.subr.msk.mxu0 %vm1972_vm11, %v1965_v9  ;;  %v1441_v10 = vpop.permute.xlu0 %1440  ;;  %v1949_v58 = vld [vmem:[#allocation3 + $0x48] sm:$0xff] }
 0x1cd   : > { %1268 = vrot.lane.b32.xlu1 %v3296_v8, %s2385_s26  ;;  %1529 = vst.msk [vmem:[#allocation3 + $0x40] sm:$0xff] %vm1520_vm8, %v1441_v10  ;;  %2334 = vmatpush3.xpose.msk.msra.mxu0 %vm1972_vm11, %v1949_v58  ;;  %v1166_v10 = vld [vmem:[#allocation2 + $0x1a] sm:$0xff] }
 0x1ce   : > { %1462 = vrot.lane.b32.xlu0 %v1379_v4, %s2386_s27 }
 0x1cf   : > { %v891_v49 = vpop.permute.xlu1 %890 }
 0x1d0   : > { %964 = vst.msk [vmem:[#allocation3 + $0xb8] sm:$0xff] %vm940_vm5, %v891_v49  ;;  %v859_v29 = vpop.permute.xlu0 %858 }
 0x1d1   : > { %1236 = vrot.lane.b32.xlu1 %v3305_v36, %s2385_s26  ;;  %948 = vst.msk [vmem:[#allocation3 + $0x38] sm:$0xff] %vm940_vm5, %v859_v29 }
 0x1d2   : > { %1430 = vrot.lane.b32.xlu0 %v3177_v34, %s2386_s27 }
 0x1d3   : > { %v1666_v18 = vpop.permute.xlu1 %1665 }
 0x1d4   : > { %1738 = vst.msk [vmem:[#allocation3 + $0xc0] sm:$0xff] %vm1713_vm9, %v1666_v18  ;;  %v1634_v48 = vpop.permute.xlu0 %1633 }
 0x1d5   : > { %880 = vrot.lane.b32.xlu1 %v3313_v44, %s2383_s24  ;;  %1722 = vst.msk [vmem:[#allocation3 + $0x40] sm:$0xff] %vm1713_vm9, %v1634_v48 }
 0x1d6   : > { %848 = vrot.lane.b32.xlu0 %v3319_v23, %s2383_s24 }
 0x1d7   : > { %v1084_v57 = vpop.permute.xlu1 %1083 }
 0x1d8   : > { %1157 = vst.msk [vmem:[#allocation3 + $0xb8] sm:$0xff] %vm1133_vm6, %v1084_v57  ;;  %v1052_v34 = vpop.permute.xlu0 %1051 }
 0x1d9   : > { %1655 = vrot.lane.b32.xlu1 %v3187_v20, %s2387_s28  ;;  %1141 = vst.msk [vmem:[#allocation3 + $0x38] sm:$0xff] %vm1133_vm6, %v1052_v34 }
 0x1da   : > { %1623 = vrot.lane.b32.xlu0 %v3193_v12, %s2387_s28 }
 0x1db   : > { %v1859_v41 = vpop.permute.xlu1 %1858 }
 0x1dc   : > { %1931 = vst.msk [vmem:[#allocation3 + $0xc0] sm:$0xff] %vm1906_vm10, %v1859_v41  ;;  %v1827_v31 = vpop.permute.xlu0 %1826 }
 0x1dd   : > { %1073 = vrot.lane.b32.xlu1 %v3329_v62, %s2384_s25  ;;  %1915 = vst.msk [vmem:[#allocation3 + $0x40] sm:$0xff] %vm1906_vm10, %v1827_v31 }
 0x1de   : > { %1041 = vrot.lane.b32.xlu0 %v3335_v1, %s2384_s25 }
 0x1df   : > { %v1277_v20 = vpop.permute.xlu1 %1276 }
 0x1e0   : > { %1350 = vst.msk [vmem:[#allocation3 + $0xb8] sm:$0xff] %vm1326_vm7, %v1277_v20  ;;  %v1471_v12 = vpop.permute.xlu0 %1470 }
 0x1e1   : > { %1848 = vrot.lane.b32.xlu1 %v3202_v24, %s2388_s29  ;;  %1544 = vst.msk [vmem:[#allocation3 + $0xb8] sm:$0xff] %vm1520_vm8, %v1471_v12 }
 0x1e2   : > { %1816 = vrot.lane.b32.xlu0 %v3210_v51, %s2388_s29 }
 0x1e3   : > { %v1245_v6 = vpop.permute.xlu1 %1244  ;;  %v1964_v25 = vld [vmem:[#allocation3 + $0xc0] sm:$0xff] }
 0x1e4   : > { %1334 = vst.msk [vmem:[#allocation3 + $0x38] sm:$0xff] %vm1326_vm7, %v1245_v6  ;;  %2335 = vmatprep.subr.msk.mxu0 %vm1972_vm11, %v1964_v25  ;;  %v1439_v38 = vpop.permute.xlu0 %1438  ;;  %v1948_v24 = vld [vmem:[#allocation3 + $0x40] sm:$0xff] }
 0x1e5   : > { %1266 = vrot.lane.b32.xlu1 %v3345_v16, %s2385_s26  ;;  %1528 = vst.msk [vmem:[#allocation3 + $0x38] sm:$0xff] %vm1520_vm8, %v1439_v38  ;;  %2336 = vmatpush3.xpose.msk.msra.mxu0 %vm1972_vm11, %v1948_v24 }
 0x1e6   : > { %1460 = vrot.lane.b32.xlu0 %v1378_v56, %s2386_s27 }
 0x1e7   : > { %v889_v21 = vpop.permute.xlu1 %888 }
 0x1e8   : > { %963 = vst.msk [vmem:[#allocation3 + $0xb0] sm:$0xff] %vm940_vm5, %v889_v21  ;;  %v857_v51 = vpop.permute.xlu0 %856 }
 0x1e9   : > { %1234 = vrot.lane.b32.xlu1 %v3354_v5, %s2385_s26  ;;  %947 = vst.msk [vmem:[#allocation3 + $0x30] sm:$0xff] %vm940_vm5, %v857_v51 }
 0x1ea   : > { %1428 = vrot.lane.b32.xlu0 %v3222_v43, %s2386_s27 }
 0x1eb   : > { %v1664_v22 = vpop.permute.xlu1 %1663 }
 0x1ec   : > { %1737 = vst.msk [vmem:[#allocation3 + $0xb8] sm:$0xff] %vm1713_vm9, %v1664_v22  ;;  %v1632_v32 = vpop.permute.xlu0 %1631 }
 0x1ed   : > { %878 = vrot.lane.b32.xlu1 %v797_v50, %s2383_s24  ;;  %1721 = vst.msk [vmem:[#allocation3 + $0x38] sm:$0xff] %vm1713_vm9, %v1632_v32 }
 0x1ee   : > { %846 = vrot.lane.b32.xlu0 %v781_v14, %s2383_s24 }
 0x1ef   : > { %v1082_v47 = vpop.permute.xlu1 %1081 }
 0x1f0   : > { %1156 = vst.msk [vmem:[#allocation3 + $0xb0] sm:$0xff] %vm1133_vm6, %v1082_v47  ;;  %v1050_v52 = vpop.permute.xlu0 %1049 }
 0x1f1   : > { %1653 = vrot.lane.b32.xlu1 %v3232_v61, %s2387_s28  ;;  %1140 = vst.msk [vmem:[#allocation3 + $0x30] sm:$0xff] %vm1133_vm6, %v1050_v52 }
 0x1f2   : > { %1621 = vrot.lane.b32.xlu0 %v3238_v11, %s2387_s28 }
 0x1f3   : > { %v1857_v43 = vpop.permute.xlu1 %1856 }
 0x1f4   : > { %1930 = vst.msk [vmem:[#allocation3 + $0xb8] sm:$0xff] %vm1906_vm10, %v1857_v43  ;;  %v1825_v15 = vpop.permute.xlu0 %1824 }
 0x1f5   : > { %1071 = vrot.lane.b32.xlu1 %v990_v7, %s2384_s25  ;;  %1914 = vst.msk [vmem:[#allocation3 + $0x38] sm:$0xff] %vm1906_vm10, %v1825_v15 }
 0x1f6   : > { %1039 = vrot.lane.b32.xlu0 %v974_v0, %s2384_s25 }
 0x1f7   : > { %v1275_v35 = vpop.permute.xlu1 %1274 }
 0x1f8   : > { %1349 = vst.msk [vmem:[#allocation3 + $0xb0] sm:$0xff] %vm1326_vm7, %v1275_v35  ;;  %v1469_v61 = vpop.permute.xlu0 %1468 }
 0x1f9   : > { %1846 = vrot.lane.b32.xlu1 %v3248_v17, %s2388_s29  ;;  %1543 = vst.msk [vmem:[#allocation3 + $0xb0] sm:$0xff] %vm1520_vm8, %v1469_v61 }
 0x1fa   : > { %1814 = vrot.lane.b32.xlu0 %v3257_v27, %s2388_s29 }
 0x1fb   : > { %v1243_v11 = vpop.permute.xlu1 %1242  ;;  %v1963_v37 = vld [vmem:[#allocation3 + $0xb8] sm:$0xff] }
 0x1fc   : > { %1333 = vst.msk [vmem:[#allocation3 + $0x30] sm:$0xff] %vm1326_vm7, %v1243_v11  ;;  %2337 = vmatprep.subr.msk.mxu0 %vm1972_vm11, %v1963_v37  ;;  %v1437_v53 = vpop.permute.xlu0 %1436  ;;  %v1947_v3 = vld [vmem:[#allocation3 + $0x38] sm:$0xff] }
 0x1fd   : > { %1264 = vrot.lane.b32.xlu1 %v1183_v55, %s2385_s26  ;;  %1527 = vst.msk [vmem:[#allocation3 + $0x30] sm:$0xff] %vm1520_vm8, %v1437_v53  ;;  %2338 = vmatpush3.xpose.msk.msra.mxu0 %vm1972_vm11, %v1947_v3 }
 0x1fe   : > { %1458 = vrot.lane.b32.xlu0 %v3265_v45, %s2386_s27 }
 0x1ff   : > { %v887_v17 = vpop.permute.xlu1 %886 }
 0x200   : > { %962 = vst.msk [vmem:[#allocation3 + $0xa8] sm:$0xff] %vm940_vm5, %v887_v17  ;;  %v855_v27 = vpop.permute.xlu0 %854 }
 0x201   : > { %1232 = vrot.lane.b32.xlu1 %v1167_v28, %s2385_s26  ;;  %946 = vst.msk [vmem:[#allocation3 + $0x28] sm:$0xff] %vm940_vm5, %v855_v27 }
 0x202   : > { %1426 = vrot.lane.b32.xlu0 %v3270_v19, %s2386_s27 }
 0x203   : > { %v1662_v42 = vpop.permute.xlu1 %1661 }
 0x204   : > { %1736 = vst.msk [vmem:[#allocation3 + $0xb0] sm:$0xff] %vm1713_vm9, %v1662_v42  ;;  %v1630_v40 = vpop.permute.xlu0 %1629 }
 0x205   : > { %876 = vrot.lane.b32.xlu1 %v796_v33, %s2383_s24  ;;  %1720 = vst.msk [vmem:[#allocation3 + $0x30] sm:$0xff] %vm1713_vm9, %v1630_v40 }
 0x206   : > { %844 = vrot.lane.b32.xlu0 %v780_v54, %s2383_s24 }
 0x207   : > { %v1080_v45 = vpop.permute.xlu1 %1079 }
 0x208   : > { %1155 = vst.msk [vmem:[#allocation3 + $0xa8] sm:$0xff] %vm1133_vm6, %v1080_v45  ;;  %v1048_v63 = vpop.permute.xlu0 %1047 }
 0x209   : > { %1651 = vrot.lane.b32.xlu1 %v3280_v46, %s2387_s28  ;;  %1139 = vst.msk [vmem:[#allocation3 + $0x28] sm:$0xff] %vm1133_vm6, %v1048_v63 }
 0x20a   : > { %1619 = vrot.lane.b32.xlu0 %v3286_v39, %s2387_s28 }
 0x20b   : > { %v1855_v19 = vpop.permute.xlu1 %1854 }
 0x20c   : > { %1929 = vst.msk [vmem:[#allocation3 + $0xb0] sm:$0xff] %vm1906_vm10, %v1855_v19  ;;  %v1823_v59 = vpop.permute.xlu0 %1822 }
 0x20d   : > { %1069 = vrot.lane.b32.xlu1 %v989_v60, %s2384_s25  ;;  %1913 = vst.msk [vmem:[#allocation3 + $0x30] sm:$0xff] %vm1906_vm10, %v1823_v59 }
 0x20e   : > { %1037 = vrot.lane.b32.xlu0 %v973_v2, %s2384_s25 }
 0x20f   : > { %v1273_v26 = vpop.permute.xlu1 %1272 }
 0x210   : > { %1348 = vst.msk [vmem:[#allocation3 + $0xa8] sm:$0xff] %vm1326_vm7, %v1273_v26  ;;  %v1467_v46 = vpop.permute.xlu0 %1466 }
 0x211   : > { %1844 = vrot.lane.b32.xlu1 %v3296_v8, %s2388_s29  ;;  %1542 = vst.msk [vmem:[#allocation3 + $0xa8] sm:$0xff] %vm1520_vm8, %v1467_v46 }
 0x212   : > { %1812 = vrot.lane.b32.xlu0 %v3305_v36, %s2388_s29 }
 0x213   : > { %v1241_v39 = vpop.permute.xlu1 %1240  ;;  %v1962_v30 = vld [vmem:[#allocation3 + $0xb0] sm:$0xff] }
 0x214   : > { %1332 = vst.msk [vmem:[#allocation3 + $0x28] sm:$0xff] %vm1326_vm7, %v1241_v39  ;;  %2339 = vmatprep.subr.msk.mxu0 %vm1972_vm11, %v1962_v30  ;;  %v1435_v9 = vpop.permute.xlu0 %1434  ;;  %v1946_v4 = vld [vmem:[#allocation3 + $0x30] sm:$0xff] }
 0x215   : > { %1262 = vrot.lane.b32.xlu1 %v1182_v13, %s2385_s26  ;;  %1526 = vst.msk [vmem:[#allocation3 + $0x28] sm:$0xff] %vm1520_vm8, %v1435_v9  ;;  %2340 = vmatpush3.xpose.msk.msra.mxu0 %vm1972_vm11, %v1946_v4 }
 0x216   : > { %1456 = vrot.lane.b32.xlu0 %v3313_v44, %s2386_s27  ;;  %v3439_v44 = vld [vmem:[%s3535_s1] sm:$0xff] }
 0x217   : > { %v885_v8 = vpop.permute.xlu1 %884  ;;  %2353 = vmatprep.mubr.msk.f32.mxu0 %vm1972_vm11, %v3439_v44 }
 0x218   : > { %961 = vst.msk [vmem:[#allocation3 + $0xa0] sm:$0xff] %vm940_vm5, %v885_v8  ;;  %v853_v58 = vpop.permute.xlu0 %852 }
 0x219   : > { %1230 = vrot.lane.b32.xlu1 %v1166_v10, %s2385_s26  ;;  %945 = vst.msk [vmem:[#allocation3 + $0x20] sm:$0xff] %vm940_vm5, %v853_v58 }
 0x21a   : > { %1649 = vrot.lane.b32.xlu0 %v3329_v62, %s2387_s28 }
 0x21b   : > { %v1660_v36 = vpop.permute.xlu1 %1659 }
 0x21c   : > { %1735 = vst.msk [vmem:[#allocation3 + $0xa8] sm:$0xff] %vm1713_vm9, %v1660_v36  ;;  %v1628_v49 = vpop.permute.xlu0 %1627 }
 0x21d   : > { %1424 = vrot.lane.b32.xlu1 %v3319_v23, %s2386_s27  ;;  %1719 = vst.msk [vmem:[#allocation3 + $0x28] sm:$0xff] %vm1713_vm9, %v1628_v49 }
 0x21e   : > { %1842 = vrot.lane.b32.xlu0 %v3345_v16, %s2388_s29 }
 0x21f   : > { %v1078_v29 = vpop.permute.xlu1 %1077 }
 0x220   : > { %1154 = vst.msk [vmem:[#allocation3 + $0xa0] sm:$0xff] %vm1133_vm6, %v1078_v29  ;;  %v1046_v18 = vpop.permute.xlu0 %1045 }
 0x221   : > { %1617 = vrot.lane.b32.xlu1 %v3335_v1, %s2387_s28  ;;  %1138 = vst.msk [vmem:[#allocation3 + $0x20] sm:$0xff] %vm1133_vm6, %v1046_v18 }
 0x223   : > { %v1853_v23 = vpop.permute.xlu1 %1852 }
 0x224   : > { %1928 = vst.msk [vmem:[#allocation3 + $0xa8] sm:$0xff] %vm1906_vm10, %v1853_v23  ;;  %v1821_v48 = vpop.permute.xlu0 %1820 }
 0x225   : > { %1810 = vrot.lane.b32.xlu1 %v3354_v5, %s2388_s29  ;;  %1912 = vst.msk [vmem:[#allocation3 + $0x28] sm:$0xff] %vm1906_vm10, %v1821_v48 }
 0x227   : > { %v1271_v57 = vpop.permute.xlu1 %1270 }
 0x228   : > { %1347 = vst.msk [vmem:[#allocation3 + $0xa0] sm:$0xff] %vm1326_vm7, %v1271_v57  ;;  %v1465_v34 = vpop.permute.xlu0 %1464 }
 0x229   : > { %1541 = vst.msk [vmem:[#allocation3 + $0xa0] sm:$0xff] %vm1520_vm8, %v1465_v34 }
 0x22b   : > { %v1239_v62 = vpop.permute.xlu1 %1238  ;;  %v1961_v41 = vld [vmem:[#allocation3 + $0xa8] sm:$0xff] }
 0x22c   : > { %1331 = vst.msk [vmem:[#allocation3 + $0x20] sm:$0xff] %vm1326_vm7, %v1239_v62  ;;  %2341 = vmatprep.subr.msk.mxu0 %vm1972_vm11, %v1961_v41  ;;  %v1433_v1 = vpop.permute.xlu0 %1432  ;;  %v1945_v31 = vld [vmem:[#allocation3 + $0x28] sm:$0xff] }
 0x22d   : > { %1525 = vst.msk [vmem:[#allocation3 + $0x20] sm:$0xff] %vm1520_vm8, %v1433_v1  ;;  %2342 = vmatpush3.xpose.msk.msra.mxu0 %vm1972_vm11, %v1945_v31 }
 0x22f   : > { %v883_v20 = vpop.permute.xlu1 %882 }
 0x230   : > { %960 = vst.msk [vmem:[#allocation3 + $0x98] sm:$0xff] %vm940_vm5, %v883_v20  ;;  %v851_v12 = vpop.permute.xlu0 %850 }
 0x231   : > { %944 = vst.msk [vmem:[#allocation3 + $0x18] sm:$0xff] %vm940_vm5, %v851_v12 }
 0x233   : > { %v1658_v16 = vpop.permute.xlu1 %1657 }
 0x234   : > { %1734 = vst.msk [vmem:[#allocation3 + $0xa0] sm:$0xff] %vm1713_vm9, %v1658_v16  ;;  %v1626_v6 = vpop.permute.xlu0 %1625 }
 0x235   : > { %1718 = vst.msk [vmem:[#allocation3 + $0x20] sm:$0xff] %vm1713_vm9, %v1626_v6 }
 0x237   : > { %v1076_v25 = vpop.permute.xlu1 %1075 }
 0x238   : > { %1153 = vst.msk [vmem:[#allocation3 + $0x98] sm:$0xff] %vm1133_vm6, %v1076_v25  ;;  %v1044_v56 = vpop.permute.xlu0 %1043 }
 0x239   : > { %1137 = vst.msk [vmem:[#allocation3 + $0x18] sm:$0xff] %vm1133_vm6, %v1044_v56 }
 0x23b   : > { %v1851_v38 = vpop.permute.xlu1 %1850 }
 0x23c   : > { %1927 = vst.msk [vmem:[#allocation3 + $0xa0] sm:$0xff] %vm1906_vm10, %v1851_v38  ;;  %v1819_v24 = vpop.permute.xlu0 %1818 }
 0x23d   : > { %1911 = vst.msk [vmem:[#allocation3 + $0x20] sm:$0xff] %vm1906_vm10, %v1819_v24 }
 0x23f   : > { %v1269_v5 = vpop.permute.xlu1 %1268 }
 0x240   : > { %1346 = vst.msk [vmem:[#allocation3 + $0x98] sm:$0xff] %vm1326_vm7, %v1269_v5  ;;  %v1463_v21 = vpop.permute.xlu0 %1462 }
 0x241   : > { %1540 = vst.msk [vmem:[#allocation3 + $0x98] sm:$0xff] %vm1520_vm8, %v1463_v21 }
 0x243   : > { %v1237_v51 = vpop.permute.xlu1 %1236  ;;  %v1960_v50 = vld [vmem:[#allocation3 + $0xa0] sm:$0xff] }
 0x244   : > { %1330 = vst.msk [vmem:[#allocation3 + $0x18] sm:$0xff] %vm1326_vm7, %v1237_v51  ;;  %2343 = vmatprep.subr.msk.mxu0 %vm1972_vm11, %v1960_v50  ;;  %v1431_v22 = vpop.permute.xlu0 %1430  ;;  %v1944_v14 = vld [vmem:[#allocation3 + $0x20] sm:$0xff] }
 0x245   : > { %1524 = vst.msk [vmem:[#allocation3 + $0x18] sm:$0xff] %vm1520_vm8, %v1431_v22  ;;  %2344 = vmatpush3.xpose.msk.msra.mxu0 %vm1972_vm11, %v1944_v14 }
 0x247   : > { %v881_v32 = vpop.permute.xlu1 %880 }
 0x248   : > { %959 = vst.msk [vmem:[#allocation3 + $0x90] sm:$0xff] %vm940_vm5, %v881_v32  ;;  %v849_v47 = vpop.permute.xlu0 %848 }
 0x249   : > { %943 = vst.msk [vmem:[#allocation3 + $0x10] sm:$0xff] %vm940_vm5, %v849_v47 }
 0x24b   : > { %v1656_v52 = vpop.permute.xlu1 %1655 }
 0x24c   : > { %1733 = vst.msk [vmem:[#allocation3 + $0x98] sm:$0xff] %vm1713_vm9, %v1656_v52  ;;  %v1624_v7 = vpop.permute.xlu0 %1623 }
 0x24d   : > { %1717 = vst.msk [vmem:[#allocation3 + $0x18] sm:$0xff] %vm1713_vm9, %v1624_v7 }
 0x24f   : > { %v1074_v43 = vpop.permute.xlu1 %1073 }
 0x250   : > { %1152 = vst.msk [vmem:[#allocation3 + $0x90] sm:$0xff] %vm1133_vm6, %v1074_v43  ;;  %v1042_v0 = vpop.permute.xlu0 %1041 }
 0x251   : > { %1136 = vst.msk [vmem:[#allocation3 + $0x10] sm:$0xff] %vm1133_vm6, %v1042_v0 }
 0x253   : > { %v1849_v15 = vpop.permute.xlu1 %1848 }
 0x254   : > { %1926 = vst.msk [vmem:[#allocation3 + $0x98] sm:$0xff] %vm1906_vm10, %v1849_v15  ;;  %v1817_v35 = vpop.permute.xlu0 %1816 }
 0x255   : > { %1910 = vst.msk [vmem:[#allocation3 + $0x18] sm:$0xff] %vm1906_vm10, %v1817_v35 }
 0x257   : > { %v1267_v61 = vpop.permute.xlu1 %1266 }
 0x258   : > { %1345 = vst.msk [vmem:[#allocation3 + $0x90] sm:$0xff] %vm1326_vm7, %v1267_v61  ;;  %v1461_v55 = vpop.permute.xlu0 %1460 }
 0x259   : > { %1539 = vst.msk [vmem:[#allocation3 + $0x90] sm:$0xff] %vm1520_vm8, %v1461_v55 }
 0x25b   : > { %v1235_v11 = vpop.permute.xlu1 %1234  ;;  %v1959_v37 = vld [vmem:[#allocation3 + $0x98] sm:$0xff] }
 0x25c   : > { %1329 = vst.msk [vmem:[#allocation3 + $0x10] sm:$0xff] %vm1326_vm7, %v1235_v11  ;;  %2345 = vmatprep.subr.msk.mxu0 %vm1972_vm11, %v1959_v37  ;;  %v1429_v53 = vpop.permute.xlu0 %1428  ;;  %v1943_v3 = vld [vmem:[#allocation3 + $0x18] sm:$0xff] }
 0x25d   : > { %1523 = vst.msk [vmem:[#allocation3 + $0x10] sm:$0xff] %vm1520_vm8, %v1429_v53  ;;  %2346 = vmatpush3.xpose.msk.msra.mxu0 %vm1972_vm11, %v1943_v3 }
 0x25f   : > { %v879_v28 = vpop.permute.xlu1 %878 }
 0x260   : > { %958 = vst.msk [vmem:[#allocation3 + $0x88] sm:$0xff] %vm940_vm5, %v879_v28  ;;  %v847_v17 = vpop.permute.xlu0 %846 }
 0x261   : > { %942 = vst.msk [vmem:[#allocation3 + $0x8] sm:$0xff] %vm940_vm5, %v847_v17 }
 0x263   : > { %v1654_v27 = vpop.permute.xlu1 %1653 }
 0x264   : > { %1732 = vst.msk [vmem:[#allocation3 + $0x90] sm:$0xff] %vm1713_vm9, %v1654_v27  ;;  %v1622_v33 = vpop.permute.xlu0 %1621 }
 0x265   : > { %1716 = vst.msk [vmem:[#allocation3 + $0x10] sm:$0xff] %vm1713_vm9, %v1622_v33 }
 0x267   : > { %v1072_v42 = vpop.permute.xlu1 %1071 }
 0x268   : > { %1151 = vst.msk [vmem:[#allocation3 + $0x88] sm:$0xff] %vm1133_vm6, %v1072_v42  ;;  %v1040_v54 = vpop.permute.xlu0 %1039 }
 0x269   : > { %1135 = vst.msk [vmem:[#allocation3 + $0x8] sm:$0xff] %vm1133_vm6, %v1040_v54 }
 0x26b   : > { %v1847_v40 = vpop.permute.xlu1 %1846 }
 0x26c   : > { %1925 = vst.msk [vmem:[#allocation3 + $0x90] sm:$0xff] %vm1906_vm10, %v1847_v40  ;;  %v1815_v45 = vpop.permute.xlu0 %1814 }
 0x26d   : > { %1909 = vst.msk [vmem:[#allocation3 + $0x10] sm:$0xff] %vm1906_vm10, %v1815_v45 }
 0x26f   : > { %v1265_v63 = vpop.permute.xlu1 %1264 }
 0x270   : > { %1344 = vst.msk [vmem:[#allocation3 + $0x88] sm:$0xff] %vm1326_vm7, %v1265_v63  ;;  %v1459_v60 = vpop.permute.xlu0 %1458 }
 0x271   : > { %1538 = vst.msk [vmem:[#allocation3 + $0x88] sm:$0xff] %vm1520_vm8, %v1459_v60 }
 0x273   : > { %v1233_v19 = vpop.permute.xlu1 %1232  ;;  %v1958_v2 = vld [vmem:[#allocation3 + $0x90] sm:$0xff] }
 0x274   : > { %1328 = vst.msk [vmem:[#allocation3 + $0x8] sm:$0xff] %vm1326_vm7, %v1233_v19  ;;  %2347 = vmatprep.subr.msk.mxu0 %vm1972_vm11, %v1958_v2  ;;  %v1427_v59 = vpop.permute.xlu0 %1426  ;;  %v1942_v26 = vld [vmem:[#allocation3 + $0x10] sm:$0xff] }
 0x275   : > { %1522 = vst.msk [vmem:[#allocation3 + $0x8] sm:$0xff] %vm1520_vm8, %v1427_v59  ;;  %2348 = vmatpush3.xpose.msk.msra.mxu0 %vm1972_vm11, %v1942_v26 }
 0x277   : > { %v877_v46 = vpop.permute.xlu1 %876 }
 0x278   : > { %957 = vst.msk [vmem:[#allocation3 + $0x80] sm:$0xff] %vm940_vm5, %v877_v46  ;;  %v845_v13 = vpop.permute.xlu0 %844 }
 0x279   : > { %941 = vst.msk [vmem:[#allocation3] sm:$0xff] %vm940_vm5, %v845_v13 }
 0x27b   : > { %v1652_v39 = vpop.permute.xlu1 %1651 }
 0x27c   : > { %1731 = vst.msk [vmem:[#allocation3 + $0x88] sm:$0xff] %vm1713_vm9, %v1652_v39  ;;  %v1620_v30 = vpop.permute.xlu0 %1619 }
 0x27d   : > { %1715 = vst.msk [vmem:[#allocation3 + $0x8] sm:$0xff] %vm1713_vm9, %v1620_v30 }
 0x27f   : > { %v1070_v9 = vpop.permute.xlu1 %1069 }
 0x280   : > { %1150 = vst.msk [vmem:[#allocation3 + $0x80] sm:$0xff] %vm1133_vm6, %v1070_v9  ;;  %v1038_v4 = vpop.permute.xlu0 %1037 }
 0x281   : > { %1134 = vst.msk [vmem:[#allocation3] sm:$0xff] %vm1133_vm6, %v1038_v4 }
 0x283   : > { %v1845_v10 = vpop.permute.xlu1 %1844 }
 0x284   : > { %1924 = vst.msk [vmem:[#allocation3 + $0x88] sm:$0xff] %vm1906_vm10, %v1845_v10  ;;  %v1813_v8 = vpop.permute.xlu0 %1812 }
 0x285   : > { %1908 = vst.msk [vmem:[#allocation3 + $0x8] sm:$0xff] %vm1906_vm10, %v1813_v8 }
 0x287   : > { %v1263_v58 = vpop.permute.xlu1 %1262 }
 0x288   : > { %1343 = vst.msk [vmem:[#allocation3 + $0x80] sm:$0xff] %vm1326_vm7, %v1263_v58  ;;  %v1457_v36 = vpop.permute.xlu0 %1456 }
 0x289   : > { %1537 = vst.msk [vmem:[#allocation3 + $0x80] sm:$0xff] %vm1520_vm8, %v1457_v36 }
 0x28b   : > { %v1231_v49 = vpop.permute.xlu1 %1230  ;;  %v1957_v29 = vld [vmem:[#allocation3 + $0x88] sm:$0xff] }
 0x28c   : > { %1327 = vst.msk [vmem:[#allocation3] sm:$0xff] %vm1326_vm7, %v1231_v49  ;;  %2349 = vmatprep.subr.msk.mxu0 %vm1972_vm11, %v1957_v29  ;;  %v1650_v18 = vpop.permute.xlu0 %1649  ;;  %v1941_v23 = vld [vmem:[#allocation3 + $0x8] sm:$0xff] }
 0x28d   : > { %1730 = vst.msk [vmem:[#allocation3 + $0x80] sm:$0xff] %vm1713_vm9, %v1650_v18  ;;  %2350 = vmatpush3.xpose.msk.msra.mxu0 %vm1972_vm11, %v1941_v23 }
 0x28f   : > { %v1425_v48 = vpop.permute.xlu1 %1424 }
 0x290   : > { %1521 = vst.msk [vmem:[#allocation3] sm:$0xff] %vm1520_vm8, %v1425_v48  ;;  %v1843_v57 = vpop.permute.xlu0 %1842 }
 0x291   : > { %1923 = vst.msk [vmem:[#allocation3 + $0x80] sm:$0xff] %vm1906_vm10, %v1843_v57 }
 0x293   : > { %v1618_v34 = vpop.permute.xlu1 %1617 }
 0x294   : > { %1714 = vst.msk [vmem:[#allocation3] sm:$0xff] %vm1713_vm9, %v1618_v34 }
 0x297   : > { %v1811_v62 = vpop.permute.xlu1 %1810 }
 0x298   : > { %1907 = vst.msk [vmem:[#allocation3] sm:$0xff] %vm1906_vm10, %v1811_v62  ;;  %v1956_v41 = vld [vmem:[#allocation3 + $0x80] sm:$0xff] }
 0x299   : > { %2351 = vmatprep.subr.msk.mxu0 %vm1972_vm11, %v1956_v41 }
 0x29f   : > { %v1940_v1 = vld [vmem:[#allocation3] sm:$0xff] }
 0x2a0   : > { %2352 = vmatpush3.xpose.msk.msra.mxu0 %vm1972_vm11, %v1940_v1 }
 0x2a3   : > { %2354 = vmatmul.mubr.msk.f32.vlgmr.msra.gmra.mxu0 %vm1972_vm11, %v3439_v44 }
 0x363   : > { %v2138_v31 = vpop.f32.mrf.mxu0 }
 0x364   : > { %2143 = vst [vmem:[%s210_s9] sm:$0xff] %v2138_v31  ;;  %v2150_v12 = vmul.f32 %v2138_v31, %v2138_v31 }
 0x365   : > { %v2140_v20 = vpop.f32.mrf.mxu0 }
 0x366   : > { %2144 = vst [vmem:[%s210_s9 + $0x8] sm:$0xff] %v2140_v20  ;;  %v2145_v16 = vadd.f32 %v2140_v20, %v2138_v31  ;;  %v2151_v6 = vmul.f32 %v2140_v20, %v2140_v20 }
 0x368   : > { %v2152_v25 = vadd.f32 %v2151_v6, %v2150_v12  ;;  %2146 = vadd.xlane.f32.xlu0 %v2145_v16 }
 0x36a   : > { %2153 = vadd.xlane.f32.xlu1 %v2152_v25 }
 0x3f1   : > { %v2147_v44 = vpop.xlane.xlu0 %2146 }
 0x3f2   : > { %2149 = vst.msk [vmem:[%s214_s13] sm:$0xff] %vm2148_vm12, %v2147_v44 }
 0x3f3   : > { %v2154_v56 = vpop.xlane.xlu1 %2153 }
 0x3f4   : > { %2155 = vst.msk [vmem:[%s218_s18] sm:$0xff] %vm2148_vm12, %v2154_v56 }
 0x3f5 PF: > { %s15_s15 = sadd.s32 1, %s2378_s15  }
 0x3f6   : > { %p12_p4 = scmp.ge.s32.totalorder %s15_s15, 4  }
 0x3f8   :  { %14 = sbr.rel (!%p12_p4) target bundleno = 1 (0x1), region = 85 }

</bundles_post_ra>
